<compile_context>
chip_gen: v7x
topology: tpu7x:2x2x1
jax: 0.10.0
libtpu: 0.0.40
codegen_flags: <defaults>
</compile_context>

<pallas_src>
import functools

import jax
import jax.numpy as jnp
import numpy as np
from jax.experimental import pallas as pl
from jax.experimental.pallas import tpu as pltpu


_LANES = 128
_VMEM_LIMIT = 48 * 1024 * 1024  # safe on v5e/v6e (128 MiB) and v7x (64 MiB)


# ----------------------------------------------------------------------------
# small helpers
# ----------------------------------------------------------------------------
def _round_up(x, m):
    return (x + m - 1) // m * m


def _pick_row_tile(ho, win, target_m=512):
    """Largest divisor `th` of `ho` with th*win <= target_m and th*win % 8 == 0.
    Falls back to the whole map (always legal: full-extent block)."""
    if ho * win <= 2 * target_m:
        return ho
    best = ho
    for th in range(1, ho + 1):
        if ho % th == 0 and th * win <= target_m and (th * win) % 8 == 0:
            best = th
    return best


# ----------------------------------------------------------------------------
# Pallas kernels
# ----------------------------------------------------------------------------
def _conv_accum(x_ref, w_ref, k, win, th, nt):
    """K*K accumulated MXU dots over a flat (rows*win, Ci) VMEM-resident image.
    Returns the f32 accumulator of shape (th*win, Co_p)."""
    row0 = 0 if nt == 1 else pl.program_id(1) * th
    mi = th * win
    acc = None
    for ky in range(k):
        for kx in range(k):
            base = (row0 + ky) * win + kx
            part = jnp.dot(x_ref[0, pl.ds(base, mi), :], w_ref[ky * k + kx],
                           preferred_element_type=jnp.float32)
            acc = part if acc is None else acc + part
    return acc


def _conv_bn_act_kernel(x_ref, w_ref, s_ref, b_ref, o_ref, *, k, win, th, nt,
                        relu):
    y = _conv_accum(x_ref, w_ref, k, win, th, nt)
    y = y * s_ref[...] + b_ref[...]
    if relu:
        y = jnp.maximum(y, 0.0)
    o_ref[0] = y.astype(o_ref.dtype)


def _conv_bn_proj_add_relu_kernel(x_ref, w_ref, s_ref, b_ref,
                                  xs_ref, ws_ref, ss_ref, bs_ref, o_ref,
                                  *, win, th, nt):
    # main 3x3 conv + BN
    y = _conv_accum(x_ref, w_ref, 3, win, th, nt)
    y = y * s_ref[...] + b_ref[...]
    # fused downsample shortcut: 1x1 conv (one extra dot) + BN
    sc = jnp.dot(xs_ref[0], ws_ref[...], preferred_element_type=jnp.float32)
    sc = sc * ss_ref[...] + bs_ref[...]
    o_ref[0] = jnp.maximum(y + sc, 0.0).astype(o_ref.dtype)


def _conv_bn_id_add_relu_kernel(x_ref, w_ref, s_ref, b_ref, xs_ref, o_ref,
                                *, win, th, nt):
    y = _conv_accum(x_ref, w_ref, 3, win, th, nt)
    y = y * s_ref[...] + b_ref[...]
    o_ref[0] = jnp.maximum(y + xs_ref[0].astype(jnp.float32),
                           0.0).astype(o_ref.dtype)


# ----------------------------------------------------------------------------
# pallas_call wrappers
# ----------------------------------------------------------------------------
def _conv_pallas_call(kernel, operands, in_specs, *, n, ho, win, th, co_p,
                      out_dtype):
    nt = ho // th
    mi = th * win
    return pl.pallas_call(
        kernel,
        out_shape=jax.ShapeDtypeStruct((n, ho * win, co_p), out_dtype),
        grid=(n, nt),
        in_specs=in_specs,
        out_specs=pl.BlockSpec((1, mi, co_p), lambda i, t: (i, t, 0)),
        compiler_params=pltpu.CompilerParams(
            dimension_semantics=("parallel", "parallel"),
            vmem_limit_bytes=_VMEM_LIMIT),
    )(*operands)


def conv3x3_bn_act(xf, wf, scale, bias, *, ho, win, k, relu, out_dtype):
    n, lf, ci = xf.shape
    co_p = wf.shape[-1]
    th = _pick_row_tile(ho, win)
    nt = ho // th
    kern = functools.partial(_conv_bn_act_kernel, k=k, win=win, th=th, nt=nt,
                             relu=relu)
    in_specs = [
        pl.BlockSpec((1, lf, ci), lambda i, t: (i, 0, 0)),     # resident image
        pl.BlockSpec((k * k, ci, co_p), lambda i, t: (0, 0, 0)),
        pl.BlockSpec((1, co_p), lambda i, t: (0, 0)),
        pl.BlockSpec((1, co_p), lambda i, t: (0, 0)),
    ]
    return _conv_pallas_call(kern, (xf, wf, scale, bias), in_specs,
                             n=n, ho=ho, win=win, th=th, co_p=co_p,
                             out_dtype=out_dtype)


def conv3x3_bn_proj_add_relu(xf, wf, scale, bias, xsf, wsf, ss, bs, *, ho, win):
    n, lf, ci = xf.shape
    co_p = wf.shape[-1]
    cs = xsf.shape[-1]
    th = _pick_row_tile(ho, win)
    nt = ho // th
    mi = th * win
    kern = functools.partial(_conv_bn_proj_add_relu_kernel, win=win, th=th,
                             nt=nt)
    in_specs = [
        pl.BlockSpec((1, lf, ci), lambda i, t: (i, 0, 0)),
        pl.BlockSpec((9, ci, co_p), lambda i, t: (0, 0, 0)),
        pl.BlockSpec((1, co_p), lambda i, t: (0, 0)),
        pl.BlockSpec((1, co_p), lambda i, t: (0, 0)),
        pl.BlockSpec((1, mi, cs), lambda i, t: (i, t, 0)),     # shortcut src
        pl.BlockSpec((cs, co_p), lambda i, t: (0, 0)),
        pl.BlockSpec((1, co_p), lambda i, t: (0, 0)),
        pl.BlockSpec((1, co_p), lambda i, t: (0, 0)),
    ]
    return _conv_pallas_call(kern, (xf, wf, scale, bias, xsf, wsf, ss, bs),
                             in_specs, n=n, ho=ho, win=win, th=th, co_p=co_p,
                             out_dtype=jnp.float32)


def conv3x3_bn_id_add_relu(xf, wf, scale, bias, xsf, *, ho, win):
    n, lf, ci = xf.shape
    co_p = wf.shape[-1]
    th = _pick_row_tile(ho, win)
    nt = ho // th
    mi = th * win
    kern = functools.partial(_conv_bn_id_add_relu_kernel, win=win, th=th, nt=nt)
    in_specs = [
        pl.BlockSpec((1, lf, ci), lambda i, t: (i, 0, 0)),
        pl.BlockSpec((9, ci, co_p), lambda i, t: (0, 0, 0)),
        pl.BlockSpec((1, co_p), lambda i, t: (0, 0)),
        pl.BlockSpec((1, co_p), lambda i, t: (0, 0)),
        pl.BlockSpec((1, mi, co_p), lambda i, t: (i, t, 0)),   # identity res
    ]
    return _conv_pallas_call(kern, (xf, wf, scale, bias, xsf), in_specs,
                             n=n, ho=ho, win=win, th=th, co_p=co_p,
                             out_dtype=jnp.float32)


# ----------------------------------------------------------------------------
# plain-JAX glue: padding / space-to-depth, weight repacking, BN folding
# ----------------------------------------------------------------------------
def _prep_conv_input(x, stride):
    """Prepare NHWC input of a 3x3 / pad-1 / `stride` conv as a unit-stride,
    space-to-depth, zero-padded image (with one extra safety row) ready for
    flat-offset tap matmuls.  Returns (prepared, Ho, Wo, K_eff, Win)."""
    n, h, w, c = x.shape
    ho = (h + 2 - 3) // stride + 1
    wo = (w + 2 - 3) // stride + 1
    k_eff = (3 - 1) // stride + 1
    ph = ho + k_eff                      # (k_eff - 1) halo rows + 1 safety row
    pw = wo + k_eff - 1
    pad_b = ph * stride - (h + 1)
    pad_r = pw * stride - (w + 1)
    xp = jnp.pad(x, ((0, 0), (1, pad_b), (1, pad_r), (0, 0)))
    xp = xp.reshape(n, ph, stride, pw, stride, c)
    xp = xp.transpose(0, 1, 3, 2, 4, 5).reshape(n, ph, pw, stride * stride * c)
    return xp, ho, wo, k_eff, pw


def _prep_conv_weight(w_oihw, stride, ci_pad, co_pad):
    """(Cout, Cin, 3, 3) -> (K_eff^2, ci_pad, co_pad), matching the
    space-to-depth channel ordering of _prep_conv_input."""
    co, ci, kh, kw = w_oihw.shape
    k_eff = (kh - 1) // stride + 1
    w = jnp.transpose(w_oihw, (2, 3, 1, 0))  # (kh, kw, ci, co)
    taps = []
    for a in range(k_eff):
        for b in range(k_eff):
            blocks = []
            for py in range(stride):
                for px in range(stride):
                    ky, kx = a * stride + py, b * stride + px
                    if ky < kh and kx < kw:
                        blocks.append(w[ky, kx])
                    else:
                        blocks.append(jnp.zeros((ci, co), w.dtype))
            taps.append(jnp.concatenate(blocks, axis=0))
    wf = jnp.stack(taps, axis=0)             # (k_eff^2, stride^2*ci, co)
    return jnp.pad(wf, ((0, 0), (0, ci_pad - wf.shape[1]), (0, co_pad - co)))


def _fold_bn(gamma, beta, mean, var, co_pad, eps=1e-5):
    """Eval-mode BN folded into (scale, bias), zero-padded to co_pad lanes."""
    scale = gamma * jax.lax.rsqrt(var + eps)
    bias = beta - mean * scale
    pad = co_pad - scale.shape[0]
    return (jnp.pad(scale, (0, pad)).reshape(1, -1).astype(jnp.float32),
            jnp.pad(bias, (0, pad)).reshape(1, -1).astype(jnp.float32))


# ----------------------------------------------------------------------------
# BasicBlock forward
# ----------------------------------------------------------------------------
def _basic_block_nhwc(x, params, stride):
    n, h, w, cin = x.shape
    cout = params["w1"].shape[0]
    co_p = _round_up(cout, _LANES)

    # ---- conv1 (3x3, stride) + BN1 + ReLU ----
    x1, ho, wo, k1, win1 = _prep_conv_input(x, stride)
    ci1 = x1.shape[-1]
    x1f = x1.reshape(n, -1, ci1).astype(jnp.bfloat16)
    w1f = _prep_conv_weight(params["w1"], stride, ci1, co_p).astype(jnp.bfloat16)
    s1, b1 = _fold_bn(*params["bn1"], co_p)
    y1f = conv3x3_bn_act(x1f, w1f, s1, b1, ho=ho, win=win1, k=k1,
                         relu=True, out_dtype=jnp.bfloat16)
    y1 = y1f.reshape(n, ho, win1, co_p)[:, :, :wo, :]   # drop wrap columns

    # ---- conv2 (3x3, stride 1) + BN2 + shortcut + ReLU (one fused kernel) ----
    y2, _, _, _, win2 = _prep_conv_input(y1, 1)
    y2f = y2.reshape(n, -1, co_p)                        # already bf16
    w2f = _prep_conv_weight(params["w2"], 1, co_p, co_p).astype(jnp.bfloat16)
    s2, b2 = _fold_bn(*params["bn2"], co_p)

    if stride != 1 or cin != cout:
        # projection shortcut: 1x1 conv (stride) + BN, fused into kernel 2
        xs = x[:, ::stride, ::stride, :][:, :ho, :wo, :]
        xs = jnp.pad(xs, ((0, 0), (0, 0), (0, win2 - wo), (0, 0)))
        xsf = xs.reshape(n, -1, cin).astype(jnp.bfloat16)
        wsf = jnp.pad(params["ws"].reshape(cout, cin).T,
                      ((0, 0), (0, co_p - cout))).astype(jnp.bfloat16)
        ss, bs = _fold_bn(*params["bns"], co_p)
        outf = conv3x3_bn_proj_add_relu(y2f, w2f, s2, b2, xsf, wsf, ss, bs,
                                        ho=ho, win=win2)
    else:
        # identity shortcut, added in f32 for fidelity of the residual stream
        xs = jnp.pad(x, ((0, 0), (0, 0), (0, win2 - wo), (0, co_p - cin)))
        xsf = xs.reshape(n, -1, co_p).astype(jnp.float32)
        outf = conv3x3_bn_id_add_relu(y2f, w2f, s2, b2, xsf, ho=ho, win=win2)

    return outf.reshape(n, ho, win2, co_p)[:, :, :wo, :cout]


@functools.partial(jax.jit, static_argnums=(2,))
def basic_block_forward_nhwc(x_nhwc, params, stride=1):
    """NHWC in / NHWC out.  Prefer this when stacking blocks (no per-block
    NCHW<->NHWC transposes)."""
    return _basic_block_nhwc(x_nhwc, params, stride)


@functools.partial(jax.jit, static_argnums=(2,))
def basic_block_forward(x_nchw, params, stride=1):
    """PyTorch-layout wrapper: NCHW in / NCHW out."""
    x = jnp.transpose(x_nchw, (0, 2, 3, 1))
    y = _basic_block_nhwc(x, params, stride)
    return jnp.transpose(y, (0, 3, 1, 2))


# ----------------------------------------------------------------------------
# pure-JAX reference (for correctness check)
# ----------------------------------------------------------------------------
def basic_block_reference(x_nchw, params, stride):
    x = jnp.transpose(x_nchw, (0, 2, 3, 1))
    cin = x.shape[-1]
    cout = params["w1"].shape[0]

    def conv(xin, w_oihw, s, pad):
        w = jnp.transpose(w_oihw, (2, 3, 1, 0))  # HWIO
        return jax.lax.conv_general_dilated(
            xin, w, (s, s), pad, dimension_numbers=("NHWC", "HWIO", "NHWC"))

    def bn(xin, stats):
        g, b, m, v = stats
        return (xin - m) / jnp.sqrt(v + 1e-5) * g + b

    y = jax.nn.relu(bn(conv(x, params["w1"], stride, ((1, 1), (1, 1))),
                       params["bn1"]))
    y = bn(conv(y, params["w2"], 1, ((1, 1), (1, 1))), params["bn2"])
    if stride != 1 or cin != cout:
        sc = bn(conv(x, params["ws"], stride, ((0, 0), (0, 0))), params["bns"])
    else:
        sc = x
    return jnp.transpose(jax.nn.relu(y + sc), (0, 3, 1, 2))


# ----------------------------------------------------------------------------
if __name__ == "__main__":
    # TODO(synk): BatchNorm is eval-mode only (running stats folded into an
    # affine); training-mode batch statistics are not implemented.
    key = jax.random.PRNGKey(0)

    def bn_stats(k, c):
        ks = jax.random.split(k, 4)
        gamma = 1.0 + 0.1 * jax.random.normal(ks[0], (c,), jnp.float32)
        beta = 0.1 * jax.random.normal(ks[1], (c,), jnp.float32)
        mean = 0.1 * jax.random.normal(ks[2], (c,), jnp.float32)
        var = jnp.abs(1.0 + 0.1 * jax.random.normal(ks[3], (c,), jnp.float32))
        return (gamma, beta, mean, var)

    # --- case 1: downsampling block (stride 2, Cin != Cout) -> projection path
    N, Cin, H, W = 2, 4, 16, 16
    Cout, stride = 8, 2
    keys = jax.random.split(key, 8)
    params = {
        "w1": 0.2 * jax.random.normal(keys[0], (Cout, Cin, 3, 3), jnp.float32),
        "bn1": bn_stats(keys[1], Cout),
        "w2": 0.2 * jax.random.normal(keys[2], (Cout, Cout, 3, 3), jnp.float32),
        "bn2": bn_stats(keys[3], Cout),
        "ws": 0.2 * jax.random.normal(keys[4], (Cout, Cin, 1, 1), jnp.float32),
        "bns": bn_stats(keys[5], Cout),
    }
    x = jax.random.normal(keys[6], (N, Cin, H, W), jnp.float32)

    out = jax.block_until_ready(basic_block_forward(x, params, stride))
    ref = jax.block_until_ready(basic_block_reference(x, params, stride))
    assert out.shape == (N, Cout, H // stride, W // stride), out.shape
    # bf16 MXU inputs (f32 accumulation) vs. a pure-f32 XLA reference.
    np.testing.assert_allclose(np.asarray(out), np.asarray(ref),
                               rtol=2e-2, atol=3e-2)

    # --- case 2: identity-shortcut block (stride 1, Cin == Cout)
    C2 = 8
    keys2 = jax.random.split(keys[7], 6)
    params2 = {
        "w1": 0.2 * jax.random.normal(keys2[0], (C2, C2, 3, 3), jnp.float32),
        "bn1": bn_stats(keys2[1], C2),
        "w2": 0.2 * jax.random.normal(keys2[2], (C2, C2, 3, 3), jnp.float32),
        "bn2": bn_stats(keys2[3], C2),
    }
    x2 = jax.random.normal(keys2[4], (N, C2, H, W), jnp.float32)

    out2 = jax.block_until_ready(basic_block_forward(x2, params2, 1))
    ref2 = jax.block_until_ready(basic_block_reference(x2, params2, 1))
    assert out2.shape == (N, C2, H, W), out2.shape
    np.testing.assert_allclose(np.asarray(out2), np.asarray(ref2),
                               rtol=2e-2, atol=3e-2)

    print("KERNEL_OK")
</pallas_src>

<mosaic_0001>
module attributes {stable_mosaic.version = 11 : i64} {
  func.func @_conv_bn_act_kernel(%arg0: i32, %arg1: i32, %arg2: memref<1x90x16xbf16, #tpu.memory_space<vmem>>, %arg3: memref<4x16x128xbf16, #tpu.memory_space<vmem>>, %arg4: memref<1x128xf32, #tpu.memory_space<vmem>>, %arg5: memref<1x128xf32, #tpu.memory_space<vmem>>, %arg6: memref<1x72x128xbf16, #tpu.memory_space<vmem>>) attributes {dimension_semantics = [#tpu.dimension_semantics<parallel>, #tpu.dimension_semantics<parallel>], iteration_bounds = array<i64: 2, 1>, scalar_prefetch = 0 : i64, scratch_operands = 0 : i64, tpu.core_type = #tpu.core_type<tc>, window_params = [{transform_indices = @transform_0, window_bounds = array<i64: 1, 90, 16>}, {pipeline_mode = #tpu.pipeline_mode<synchronous>, transform_indices = @transform_1, window_bounds = array<i64: 4, 16, 128>}, {pipeline_mode = #tpu.pipeline_mode<synchronous>, transform_indices = @transform_2, window_bounds = array<i64: 1, 128>}, {pipeline_mode = #tpu.pipeline_mode<synchronous>, transform_indices = @transform_3, window_bounds = array<i64: 1, 128>}, {transform_indices = @transform_4, window_bounds = array<i64: 1, 72, 128>}]} {
    %c0 = arith.constant 0 : index
    %c0_0 = arith.constant 0 : index
    %c0_1 = arith.constant 0 : index
    %0 = vector.load %arg2[%c0, %c0_0, %c0_1] : memref<1x90x16xbf16, #tpu.memory_space<vmem>>, vector<1x72x16xbf16>
    %1 = vector.shape_cast %0 : vector<1x72x16xbf16> to vector<72x16xbf16>
    %c0_2 = arith.constant 0 : index
    %c0_3 = arith.constant 0 : index
    %c0_4 = arith.constant 0 : index
    %2 = vector.load %arg3[%c0_2, %c0_3, %c0_4] : memref<4x16x128xbf16, #tpu.memory_space<vmem>>, vector<1x16x128xbf16>
    %3 = vector.shape_cast %2 : vector<1x16x128xbf16> to vector<16x128xbf16>
    %cst = arith.constant dense<0.000000e+00> : vector<72x128xf32>
    %4 = tpu.matmul %1, %3, %cst {dimension_numbers = #tpu.dot_dimension_numbers<[1], [0], [0], [1], [0, 0, 1, 1], [], []>} : vector<72x16xbf16>, vector<16x128xbf16>, vector<72x128xf32> -> vector<72x128xf32>
    %c0_5 = arith.constant 0 : index
    %c1 = arith.constant 1 : index
    %c0_6 = arith.constant 0 : index
    %5 = vector.load %arg2[%c0_5, %c1, %c0_6] : memref<1x90x16xbf16, #tpu.memory_space<vmem>>, vector<1x72x16xbf16>
    %6 = vector.shape_cast %5 : vector<1x72x16xbf16> to vector<72x16xbf16>
    %c1_7 = arith.constant 1 : index
    %c0_8 = arith.constant 0 : index
    %c0_9 = arith.constant 0 : index
    %7 = vector.load %arg3[%c1_7, %c0_8, %c0_9] : memref<4x16x128xbf16, #tpu.memory_space<vmem>>, vector<1x16x128xbf16>
    %8 = vector.shape_cast %7 : vector<1x16x128xbf16> to vector<16x128xbf16>
    %cst_10 = arith.constant dense<0.000000e+00> : vector<72x128xf32>
    %9 = tpu.matmul %6, %8, %cst_10 {dimension_numbers = #tpu.dot_dimension_numbers<[1], [0], [0], [1], [0, 0, 1, 1], [], []>} : vector<72x16xbf16>, vector<16x128xbf16>, vector<72x128xf32> -> vector<72x128xf32>
    %10 = arith.addf %4, %9 : vector<72x128xf32>
    %c0_11 = arith.constant 0 : index
    %c9 = arith.constant 9 : index
    %c0_12 = arith.constant 0 : index
    %11 = vector.load %arg2[%c0_11, %c9, %c0_12] : memref<1x90x16xbf16, #tpu.memory_space<vmem>>, vector<1x72x16xbf16>
    %12 = vector.shape_cast %11 : vector<1x72x16xbf16> to vector<72x16xbf16>
    %c2 = arith.constant 2 : index
    %c0_13 = arith.constant 0 : index
    %c0_14 = arith.constant 0 : index
    %13 = vector.load %arg3[%c2, %c0_13, %c0_14] : memref<4x16x128xbf16, #tpu.memory_space<vmem>>, vector<1x16x128xbf16>
    %14 = vector.shape_cast %13 : vector<1x16x128xbf16> to vector<16x128xbf16>
    %cst_15 = arith.constant dense<0.000000e+00> : vector<72x128xf32>
    %15 = tpu.matmul %12, %14, %cst_15 {dimension_numbers = #tpu.dot_dimension_numbers<[1], [0], [0], [1], [0, 0, 1, 1], [], []>} : vector<72x16xbf16>, vector<16x128xbf16>, vector<72x128xf32> -> vector<72x128xf32>
    %16 = arith.addf %10, %15 : vector<72x128xf32>
    %c0_16 = arith.constant 0 : index
    %c10 = arith.constant 10 : index
    %c0_17 = arith.constant 0 : index
    %17 = vector.load %arg2[%c0_16, %c10, %c0_17] : memref<1x90x16xbf16, #tpu.memory_space<vmem>>, vector<1x72x16xbf16>
    %18 = vector.shape_cast %17 : vector<1x72x16xbf16> to vector<72x16xbf16>
    %c3 = arith.constant 3 : index
    %c0_18 = arith.constant 0 : index
    %c0_19 = arith.constant 0 : index
    %19 = vector.load %arg3[%c3, %c0_18, %c0_19] : memref<4x16x128xbf16, #tpu.memory_space<vmem>>, vector<1x16x128xbf16>
    %20 = vector.shape_cast %19 : vector<1x16x128xbf16> to vector<16x128xbf16>
    %cst_20 = arith.constant dense<0.000000e+00> : vector<72x128xf32>
    %21 = tpu.matmul %18, %20, %cst_20 {dimension_numbers = #tpu.dot_dimension_numbers<[1], [0], [0], [1], [0, 0, 1, 1], [], []>} : vector<72x16xbf16>, vector<16x128xbf16>, vector<72x128xf32> -> vector<72x128xf32>
    %22 = arith.addf %16, %21 : vector<72x128xf32>
    %c0_21 = arith.constant 0 : index
    %c0_22 = arith.constant 0 : index
    %23 = vector.load %arg4[%c0_21, %c0_22] : memref<1x128xf32, #tpu.memory_space<vmem>>, vector<1x128xf32>
    %24 = vector.broadcast %23 : vector<1x128xf32> to vector<72x128xf32>
    %25 = arith.mulf %22, %24 : vector<72x128xf32>
    %c0_23 = arith.constant 0 : index
    %c0_24 = arith.constant 0 : index
    %26 = vector.load %arg5[%c0_23, %c0_24] : memref<1x128xf32, #tpu.memory_space<vmem>>, vector<1x128xf32>
    %27 = vector.broadcast %26 : vector<1x128xf32> to vector<72x128xf32>
    %28 = arith.addf %25, %27 : vector<72x128xf32>
    %cst_25 = arith.constant 0.000000e+00 : f32
    %29 = vector.broadcast %cst_25 : f32 to vector<72x128xf32>
    %30 = arith.maximumf %28, %29 : vector<72x128xf32>
    %31 = arith.truncf %30 : vector<72x128xf32> to vector<72x128xbf16>
    %c0_26 = arith.constant 0 : index
    %c0_27 = arith.constant 0 : index
    %c0_28 = arith.constant 0 : index
    %32 = vector.load %arg6[%c0_26, %c0_27, %c0_28] : memref<1x72x128xbf16, #tpu.memory_space<vmem>>, vector<1x72x128xbf16>
    %33 = vector.shape_cast %32 : vector<1x72x128xbf16> to vector<72x128xbf16>
    %34 = vector.shape_cast %31 : vector<72x128xbf16> to vector<1x72x128xbf16>
    tpu.vector_store %arg6[%c0_26, %c0_27, %c0_28], %34 {strides = array<i32>} : memref<1x72x128xbf16, #tpu.memory_space<vmem>>, vector<1x72x128xbf16>,
    return
  }
  func.func @transform_0(%arg0: i32, %arg1: i32) -> (i32, i32, i32) {
    %c0_i32 = arith.constant 0 : i32
    %c0_i32_0 = arith.constant 0 : i32
    %c0_i32_1 = arith.constant 0 : i32
    return %arg0, %c0_i32, %c0_i32_0 : i32, i32, i32
  }
  func.func @transform_1(%arg0: i32, %arg1: i32) -> (i32, i32, i32) {
    %c0_i32 = arith.constant 0 : i32
    %c0_i32_0 = arith.constant 0 : i32
    %c0_i32_1 = arith.constant 0 : i32
    %c0_i32_2 = arith.constant 0 : i32
    return %c0_i32, %c0_i32_0, %c0_i32_1 : i32, i32, i32
  }
  func.func @transform_2(%arg0: i32, %arg1: i32) -> (i32, i32) {
    %c0_i32 = arith.constant 0 : i32
    %c0_i32_0 = arith.constant 0 : i32
    %c0_i32_1 = arith.constant 0 : i32
    return %c0_i32, %c0_i32_0 : i32, i32
  }
  func.func @transform_3(%arg0: i32, %arg1: i32) -> (i32, i32) {
    %c0_i32 = arith.constant 0 : i32
    %c0_i32_0 = arith.constant 0 : i32
    %c0_i32_1 = arith.constant 0 : i32
    return %c0_i32, %c0_i32_0 : i32, i32
  }
  func.func @transform_4(%arg0: i32, %arg1: i32) -> (i32, i32, i32) {
    %c0_i32 = arith.constant 0 : i32
    %c0_i32_0 = arith.constant 0 : i32
    return %arg0, %arg1, %c0_i32 : i32, i32, i32
  }
}

module attributes {stable_mosaic.version = 11 : i64} {
  func.func @_conv_bn_proj_add_relu_kernel(%arg0: i32, %arg1: i32, %arg2: memref<1x110x128xbf16, #tpu.memory_space<vmem>>, %arg3: memref<9x128x128xbf16, #tpu.memory_space<vmem>>, %arg4: memref<1x128xf32, #tpu.memory_space<vmem>>, %arg5: memref<1x128xf32, #tpu.memory_space<vmem>>, %arg6: memref<1x80x4xbf16, #tpu.memory_space<vmem>>, %arg7: memref<4x128xbf16, #tpu.memory_space<vmem>>, %arg8: memref<1x128xf32, #tpu.memory_space<vmem>>, %arg9: memref<1x128xf32, #tpu.memory_space<vmem>>, %arg10: memref<1x80x128xf32, #tpu.memory_space<vmem>>) attributes {dimension_semantics = [#tpu.dimension_semantics<parallel>, #tpu.dimension_semantics<parallel>], iteration_bounds = array<i64: 2, 1>, scalar_prefetch = 0 : i64, scratch_operands = 0 : i64, tpu.core_type = #tpu.core_type<tc>, window_params = [{transform_indices = @transform_0, window_bounds = array<i64: 1, 110, 128>}, {pipeline_mode = #tpu.pipeline_mode<synchronous>, transform_indices = @transform_1, window_bounds = array<i64: 9, 128, 128>}, {pipeline_mode = #tpu.pipeline_mode<synchronous>, transform_indices = @transform_2, window_bounds = array<i64: 1, 128>}, {pipeline_mode = #tpu.pipeline_mode<synchronous>, transform_indices = @transform_3, window_bounds = array<i64: 1, 128>}, {transform_indices = @transform_4, window_bounds = array<i64: 1, 80, 4>}, {pipeline_mode = #tpu.pipeline_mode<synchronous>, transform_indices = @transform_5, window_bounds = array<i64: 4, 128>}, {pipeline_mode = #tpu.pipeline_mode<synchronous>, transform_indices = @transform_6, window_bounds = array<i64: 1, 128>}, {pipeline_mode = #tpu.pipeline_mode<synchronous>, transform_indices = @transform_7, window_bounds = array<i64: 1, 128>}, {transform_indices = @transform_8, window_bounds = array<i64: 1, 80, 128>}]} {
    %c0 = arith.constant 0 : index
    %c0_0 = arith.constant 0 : index
    %c0_1 = arith.constant 0 : index
    %0 = vector.load %arg2[%c0, %c0_0, %c0_1] : memref<1x110x128xbf16, #tpu.memory_space<vmem>>, vector<1x80x128xbf16>
    %1 = vector.shape_cast %0 : vector<1x80x128xbf16> to vector<80x128xbf16>
    %c0_2 = arith.constant 0 : index
    %c0_3 = arith.constant 0 : index
    %c0_4 = arith.constant 0 : index
    %2 = vector.load %arg3[%c0_2, %c0_3, %c0_4] : memref<9x128x128xbf16, #tpu.memory_space<vmem>>, vector<1x128x128xbf16>
    %3 = vector.shape_cast %2 : vector<1x128x128xbf16> to vector<128x128xbf16>
    %cst = arith.constant dense<0.000000e+00> : vector<80x128xf32>
    %4 = tpu.matmul %1, %3, %cst {dimension_numbers = #tpu.dot_dimension_numbers<[1], [0], [0], [1], [0, 0, 1, 1], [], []>} : vector<80x128xbf16>, vector<128x128xbf16>, vector<80x128xf32> -> vector<80x128xf32>
    %c0_5 = arith.constant 0 : index
    %c1 = arith.constant 1 : index
    %c0_6 = arith.constant 0 : index
    %5 = vector.load %arg2[%c0_5, %c1, %c0_6] : memref<1x110x128xbf16, #tpu.memory_space<vmem>>, vector<1x80x128xbf16>
    %6 = vector.shape_cast %5 : vector<1x80x128xbf16> to vector<80x128xbf16>
    %c1_7 = arith.constant 1 : index
    %c0_8 = arith.constant 0 : index
    %c0_9 = arith.constant 0 : index
    %7 = vector.load %arg3[%c1_7, %c0_8, %c0_9] : memref<9x128x128xbf16, #tpu.memory_space<vmem>>, vector<1x128x128xbf16>
    %8 = vector.shape_cast %7 : vector<1x128x128xbf16> to vector<128x128xbf16>
    %cst_10 = arith.constant dense<0.000000e+00> : vector<80x128xf32>
    %9 = tpu.matmul %6, %8, %cst_10 {dimension_numbers = #tpu.dot_dimension_numbers<[1], [0], [0], [1], [0, 0, 1, 1], [], []>} : vector<80x128xbf16>, vector<128x128xbf16>, vector<80x128xf32> -> vector<80x128xf32>
    %10 = arith.addf %4, %9 : vector<80x128xf32>
    %c0_11 = arith.constant 0 : index
    %c2 = arith.constant 2 : index
    %c0_12 = arith.constant 0 : index
    %11 = vector.load %arg2[%c0_11, %c2, %c0_12] : memref<1x110x128xbf16, #tpu.memory_space<vmem>>, vector<1x80x128xbf16>
    %12 = vector.shape_cast %11 : vector<1x80x128xbf16> to vector<80x128xbf16>
    %c2_13 = arith.constant 2 : index
    %c0_14 = arith.constant 0 : index
    %c0_15 = arith.constant 0 : index
    %13 = vector.load %arg3[%c2_13, %c0_14, %c0_15] : memref<9x128x128xbf16, #tpu.memory_space<vmem>>, vector<1x128x128xbf16>
    %14 = vector.shape_cast %13 : vector<1x128x128xbf16> to vector<128x128xbf16>
    %cst_16 = arith.constant dense<0.000000e+00> : vector<80x128xf32>
    %15 = tpu.matmul %12, %14, %cst_16 {dimension_numbers = #tpu.dot_dimension_numbers<[1], [0], [0], [1], [0, 0, 1, 1], [], []>} : vector<80x128xbf16>, vector<128x128xbf16>, vector<80x128xf32> -> vector<80x128xf32>
    %16 = arith.addf %10, %15 : vector<80x128xf32>
    %c0_17 = arith.constant 0 : index
    %c10 = arith.constant 10 : index
    %c0_18 = arith.constant 0 : index
    %17 = vector.load %arg2[%c0_17, %c10, %c0_18] : memref<1x110x128xbf16, #tpu.memory_space<vmem>>, vector<1x80x128xbf16>
    %18 = vector.shape_cast %17 : vector<1x80x128xbf16> to vector<80x128xbf16>
    %c3 = arith.constant 3 : index
    %c0_19 = arith.constant 0 : index
    %c0_20 = arith.constant 0 : index
    %19 = vector.load %arg3[%c3, %c0_19, %c0_20] : memref<9x128x128xbf16, #tpu.memory_space<vmem>>, vector<1x128x128xbf16>
    %20 = vector.shape_cast %19 : vector<1x128x128xbf16> to vector<128x128xbf16>
    %cst_21 = arith.constant dense<0.000000e+00> : vector<80x128xf32>
    %21 = tpu.matmul %18, %20, %cst_21 {dimension_numbers = #tpu.dot_dimension_numbers<[1], [0], [0], [1], [0, 0, 1, 1], [], []>} : vector<80x128xbf16>, vector<128x128xbf16>, vector<80x128xf32> -> vector<80x128xf32>
    %22 = arith.addf %16, %21 : vector<80x128xf32>
    %c0_22 = arith.constant 0 : index
    %c11 = arith.constant 11 : index
    %c0_23 = arith.constant 0 : index
    %23 = vector.load %arg2[%c0_22, %c11, %c0_23] : memref<1x110x128xbf16, #tpu.memory_space<vmem>>, vector<1x80x128xbf16>
    %24 = vector.shape_cast %23 : vector<1x80x128xbf16> to vector<80x128xbf16>
    %c4 = arith.constant 4 : index
    %c0_24 = arith.constant 0 : index
    %c0_25 = arith.constant 0 : index
    %25 = vector.load %arg3[%c4, %c0_24, %c0_25] : memref<9x128x128xbf16, #tpu.memory_space<vmem>>, vector<1x128x128xbf16>
    %26 = vector.shape_cast %25 : vector<1x128x128xbf16> to vector<128x128xbf16>
    %cst_26 = arith.constant dense<0.000000e+00> : vector<80x128xf32>
    %27 = tpu.matmul %24, %26, %cst_26 {dimension_numbers = #tpu.dot_dimension_numbers<[1], [0], [0], [1], [0, 0, 1, 1], [], []>} : vector<80x128xbf16>, vector<128x128xbf16>, vector<80x128xf32> -> vector<80x128xf32>
    %28 = arith.addf %22, %27 : vector<80x128xf32>
    %c0_27 = arith.constant 0 : index
    %c12 = arith.constant 12 : index
    %c0_28 = arith.constant 0 : index
    %29 = vector.load %arg2[%c0_27, %c12, %c0_28] : memref<1x110x128xbf16, #tpu.memory_space<vmem>>, vector<1x80x128xbf16>
    %30 = vector.shape_cast %29 : vector<1x80x128xbf16> to vector<80x128xbf16>
    %c5 = arith.constant 5 : index
    %c0_29 = arith.constant 0 : index
    %c0_30 = arith.constant 0 : index
    %31 = vector.load %arg3[%c5, %c0_29, %c0_30] : memref<9x128x128xbf16, #tpu.memory_space<vmem>>, vector<1x128x128xbf16>
    %32 = vector.shape_cast %31 : vector<1x128x128xbf16> to vector<128x128xbf16>
    %cst_31 = arith.constant dense<0.000000e+00> : vector<80x128xf32>
    %33 = tpu.matmul %30, %32, %cst_31 {dimension_numbers = #tpu.dot_dimension_numbers<[1], [0], [0], [1], [0, 0, 1, 1], [], []>} : vector<80x128xbf16>, vector<128x128xbf16>, vector<80x128xf32> -> vector<80x128xf32>
    %34 = arith.addf %28, %33 : vector<80x128xf32>
    %c0_32 = arith.constant 0 : index
    %c20 = arith.constant 20 : index
    %c0_33 = arith.constant 0 : index
    %35 = vector.load %arg2[%c0_32, %c20, %c0_33] : memref<1x110x128xbf16, #tpu.memory_space<vmem>>, vector<1x80x128xbf16>
    %36 = vector.shape_cast %35 : vector<1x80x128xbf16> to vector<80x128xbf16>
    %c6 = arith.constant 6 : index
    %c0_34 = arith.constant 0 : index
    %c0_35 = arith.constant 0 : index
    %37 = vector.load %arg3[%c6, %c0_34, %c0_35] : memref<9x128x128xbf16, #tpu.memory_space<vmem>>, vector<1x128x128xbf16>
    %38 = vector.shape_cast %37 : vector<1x128x128xbf16> to vector<128x128xbf16>
    %cst_36 = arith.constant dense<0.000000e+00> : vector<80x128xf32>
    %39 = tpu.matmul %36, %38, %cst_36 {dimension_numbers = #tpu.dot_dimension_numbers<[1], [0], [0], [1], [0, 0, 1, 1], [], []>} : vector<80x128xbf16>, vector<128x128xbf16>, vector<80x128xf32> -> vector<80x128xf32>
    %40 = arith.addf %34, %39 : vector<80x128xf32>
    %c0_37 = arith.constant 0 : index
    %c21 = arith.constant 21 : index
    %c0_38 = arith.constant 0 : index
    %41 = vector.load %arg2[%c0_37, %c21, %c0_38] : memref<1x110x128xbf16, #tpu.memory_space<vmem>>, vector<1x80x128xbf16>
    %42 = vector.shape_cast %41 : vector<1x80x128xbf16> to vector<80x128xbf16>
    %c7 = arith.constant 7 : index
    %c0_39 = arith.constant 0 : index
    %c0_40 = arith.constant 0 : index
    %43 = vector.load %arg3[%c7, %c0_39, %c0_40] : memref<9x128x128xbf16, #tpu.memory_space<vmem>>, vector<1x128x128xbf16>
    %44 = vector.shape_cast %43 : vector<1x128x128xbf16> to vector<128x128xbf16>
    %cst_41 = arith.constant dense<0.000000e+00> : vector<80x128xf32>
    %45 = tpu.matmul %42, %44, %cst_41 {dimension_numbers = #tpu.dot_dimension_numbers<[1], [0], [0], [1], [0, 0, 1, 1], [], []>} : vector<80x128xbf16>, vector<128x128xbf16>, vector<80x128xf32> -> vector<80x128xf32>
    %46 = arith.addf %40, %45 : vector<80x128xf32>
    %c0_42 = arith.constant 0 : index
    %c22 = arith.constant 22 : index
    %c0_43 = arith.constant 0 : index
    %47 = vector.load %arg2[%c0_42, %c22, %c0_43] : memref<1x110x128xbf16, #tpu.memory_space<vmem>>, vector<1x80x128xbf16>
    %48 = vector.shape_cast %47 : vector<1x80x128xbf16> to vector<80x128xbf16>
    %c8 = arith.constant 8 : index
    %c0_44 = arith.constant 0 : index
    %c0_45 = arith.constant 0 : index
    %49 = vector.load %arg3[%c8, %c0_44, %c0_45] : memref<9x128x128xbf16, #tpu.memory_space<vmem>>, vector<1x128x128xbf16>
    %50 = vector.shape_cast %49 : vector<1x128x128xbf16> to vector<128x128xbf16>
    %cst_46 = arith.constant dense<0.000000e+00> : vector<80x128xf32>
    %51 = tpu.matmul %48, %50, %cst_46 {dimension_numbers = #tpu.dot_dimension_numbers<[1], [0], [0], [1], [0, 0, 1, 1], [], []>} : vector<80x128xbf16>, vector<128x128xbf16>, vector<80x128xf32> -> vector<80x128xf32>
    %52 = arith.addf %46, %51 : vector<80x128xf32>
    %c0_47 = arith.constant 0 : index
    %c0_48 = arith.constant 0 : index
    %53 = vector.load %arg4[%c0_47, %c0_48] : memref<1x128xf32, #tpu.memory_space<vmem>>, vector<1x128xf32>
    %54 = vector.broadcast %53 : vector<1x128xf32> to vector<80x128xf32>
    %55 = arith.mulf %52, %54 : vector<80x128xf32>
    %c0_49 = arith.constant 0 : index
    %c0_50 = arith.constant 0 : index
    %56 = vector.load %arg5[%c0_49, %c0_50] : memref<1x128xf32, #tpu.memory_space<vmem>>, vector<1x128xf32>
    %57 = vector.broadcast %56 : vector<1x128xf32> to vector<80x128xf32>
    %58 = arith.addf %55, %57 : vector<80x128xf32>
    %c0_51 = arith.constant 0 : index
    %c0_52 = arith.constant 0 : index
    %c0_53 = arith.constant 0 : index
    %59 = vector.load %arg6[%c0_51, %c0_52, %c0_53] : memref<1x80x4xbf16, #tpu.memory_space<vmem>>, vector<1x80x4xbf16>
    %60 = vector.shape_cast %59 : vector<1x80x4xbf16> to vector<80x4xbf16>
    %c0_54 = arith.constant 0 : index
    %c0_55 = arith.constant 0 : index
    %61 = vector.load %arg7[%c0_54, %c0_55] : memref<4x128xbf16, #tpu.memory_space<vmem>>, vector<4x128xbf16>
    %cst_56 = arith.constant dense<0.000000e+00> : vector<80x128xf32>
    %62 = tpu.matmul %60, %61, %cst_56 {dimension_numbers = #tpu.dot_dimension_numbers<[1], [0], [0], [1], [0, 0, 1, 1], [], []>} : vector<80x4xbf16>, vector<4x128xbf16>, vector<80x128xf32> -> vector<80x128xf32>
    %c0_57 = arith.constant 0 : index
    %c0_58 = arith.constant 0 : index
    %63 = vector.load %arg8[%c0_57, %c0_58] : memref<1x128xf32, #tpu.memory_space<vmem>>, vector<1x128xf32>
    %64 = vector.broadcast %63 : vector<1x128xf32> to vector<80x128xf32>
    %65 = arith.mulf %62, %64 : vector<80x128xf32>
    %c0_59 = arith.constant 0 : index
    %c0_60 = arith.constant 0 : index
    %66 = vector.load %arg9[%c0_59, %c0_60] : memref<1x128xf32, #tpu.memory_space<vmem>>, vector<1x128xf32>
    %67 = vector.broadcast %66 : vector<1x128xf32> to vector<80x128xf32>
    %68 = arith.addf %65, %67 : vector<80x128xf32>
    %69 = arith.addf %58, %68 : vector<80x128xf32>
    %cst_61 = arith.constant 0.000000e+00 : f32
    %70 = vector.broadcast %cst_61 : f32 to vector<80x128xf32>
    %71 = arith.maximumf %69, %70 : vector<80x128xf32>
    %c0_62 = arith.constant 0 : index
    %c0_63 = arith.constant 0 : index
    %c0_64 = arith.constant 0 : index
    %72 = vector.load %arg10[%c0_62, %c0_63, %c0_64] : memref<1x80x128xf32, #tpu.memory_space<vmem>>, vector<1x80x128xf32>
    %73 = vector.shape_cast %72 : vector<1x80x128xf32> to vector<80x128xf32>
    %74 = vector.shape_cast %71 : vector<80x128xf32> to vector<1x80x128xf32>
    tpu.vector_store %arg10[%c0_62, %c0_63, %c0_64], %74 {strides = array<i32>} : memref<1x80x128xf32, #tpu.memory_space<vmem>>, vector<1x80x128xf32>,
    return
  }
  func.func @transform_0(%arg0: i32, %arg1: i32) -> (i32, i32, i32) {
    %c0_i32 = arith.constant 0 : i32
    %c0_i32_0 = arith.constant 0 : i32
    %c0_i32_1 = arith.constant 0 : i32
    return %arg0, %c0_i32, %c0_i32_0 : i32, i32, i32
  }
  func.func @transform_1(%arg0: i32, %arg1: i32) -> (i32, i32, i32) {
    %c0_i32 = arith.constant 0 : i32
    %c0_i32_0 = arith.constant 0 : i32
    %c0_i32_1 = arith.constant 0 : i32
    %c0_i32_2 = arith.constant 0 : i32
    return %c0_i32, %c0_i32_0, %c0_i32_1 : i32, i32, i32
  }
  func.func @transform_2(%arg0: i32, %arg1: i32) -> (i32, i32) {
    %c0_i32 = arith.constant 0 : i32
    %c0_i32_0 = arith.constant 0 : i32
    %c0_i32_1 = arith.constant 0 : i32
    return %c0_i32, %c0_i32_0 : i32, i32
  }
  func.func @transform_3(%arg0: i32, %arg1: i32) -> (i32, i32) {
    %c0_i32 = arith.constant 0 : i32
    %c0_i32_0 = arith.constant 0 : i32
    %c0_i32_1 = arith.constant 0 : i32
    return %c0_i32, %c0_i32_0 : i32, i32
  }
  func.func @transform_4(%arg0: i32, %arg1: i32) -> (i32, i32, i32) {
    %c0_i32 = arith.constant 0 : i32
    %c0_i32_0 = arith.constant 0 : i32
    return %arg0, %arg1, %c0_i32 : i32, i32, i32
  }
  func.func @transform_5(%arg0: i32, %arg1: i32) -> (i32, i32) {
    %c0_i32 = arith.constant 0 : i32
    %c0_i32_0 = arith.constant 0 : i32
    %c0_i32_1 = arith.constant 0 : i32
    return %c0_i32, %c0_i32_0 : i32, i32
  }
  func.func @transform_6(%arg0: i32, %arg1: i32) -> (i32, i32) {
    %c0_i32 = arith.constant 0 : i32
    %c0_i32_0 = arith.constant 0 : i32
    %c0_i32_1 = arith.constant 0 : i32
    return %c0_i32, %c0_i32_0 : i32, i32
  }
  func.func @transform_7(%arg0: i32, %arg1: i32) -> (i32, i32) {
    %c0_i32 = arith.constant 0 : i32
    %c0_i32_0 = arith.constant 0 : i32
    %c0_i32_1 = arith.constant 0 : i32
    return %c0_i32, %c0_i32_0 : i32, i32
  }
  func.func @transform_8(%arg0: i32, %arg1: i32) -> (i32, i32, i32) {
    %c0_i32 = arith.constant 0 : i32
    %c0_i32_0 = arith.constant 0 : i32
    return %arg0, %arg1, %c0_i32 : i32, i32, i32
  }
}

</mosaic_0001>

<bundles_post_ra>
// kernel: basic_block_forward.2
= control target key start
LH: loop header
LB: loop body
LE: loop exit
PB: predicated region body
PF: predicated region fallthrough
CT: control target
= control target key end

     0   :  { %s1302_s15 = smov 0   ;;  %s1304_s16 = smov 0   ;;  %s1521_s0 = inlined_call_operand.vmem [shape: bf16[2,90,16], index: 0, kind: input, shape index: {}]   ;;  %s1522_s1 = inlined_call_operand.vmem [shape: bf16[4,16,128], index: 1, kind: input, shape index: {}]   ;;  %s1523_s2 = inlined_call_operand.vmem [shape: f32[1,128], index: 2, kind: input, shape index: {}]   ;;  %s1524_s3 = inlined_call_operand.vmem [shape: f32[1,128], index: 3, kind: input, shape index: {}]   ;;  %s1525_s4 = inlined_call_operand.vmem [shape: bf16[2,72,128], index: 4, kind: output, shape index: {}]  }
   0x1   :  { %s1306_s17 = smov 0  }
   0x2 LB: > { %s26_s18 = sadd.s32 1, %s1269_s16  ;;  %p956_p0 = scmp.ge.s32.totalorder %s1273_s17, 1  ;;  %s1273_s17 = sphi %s1306_s17, %s14_s17   ;;  %s1269_s16 = sphi %s1304_s16, %s1527_s16   ;;  %s1265_s15 = sphi %s1302_s15, %s1526_s15  }
   0x3   : > { %p28_p1 = scmp.ge.s32.totalorder %s26_s18, 2  ;;  %p176_p2 = scmp.lt.s32.totalorder %s1273_s17, 3 }
   0x5   : > { %s1529_s18 = smov (%p28_p1, %s26_s18), 0  ;;  %p177_p3 = pnand %p956_p0, %p176_p2 }
   0x6   : > { %v1235_v0 = vld [vmem:[%s1522_s1 + $0x8] sm:$0xff] (!%p177_p3)   ;;  %v1275_v1 = vmov (!%p177_p3), 0.0   ;;  %v1236_v2 = vld [vmem:[%s1522_s1 + $0x10] sm:$0xff] (!%p177_p3)   ;;  %vm1276_vm0 = vmmov (!%p177_p3), 0   ;;  %p206_p4 = scmp.lt.s32.totalorder (!%p177_p3), %s1265_s15, 1  ;;  %vm308_vm2 = vcmask (!%p177_p3), 130048  }
   0x7   : > { %180 = sbr.rel (%p177_p3) target bundleno = 324 (0x144), region = 36  ;;  %1070 = vmatprep.subr.bf16.mxu1 (!%p177_p3), %v1275_v1  ;;  %1114 = vmatprep.subr.bf16.mxu0 (!%p177_p3), %v1275_v1  ;;  %vm262_vm1 = vsmask.f32 (!%p177_p3), 7424  ;;  %v1239_v17 = vld [vmem:[%s1522_s1] sm:$0xff] (!%p177_p3)   ;;  %v1242_v27 = vld [vmem:[%s1522_s1 + $0x18] sm:$0xff] (!%p177_p3)   ;;  %vm672_vm3 = vcmask (!%p177_p3), 1046528  }
   0x8   : > { %1071 = vmatpush3.bf16.msra.mxu1 (!%p177_p3), %v1235_v0  ;;  %1072 = vmatprep.mubr.msk.bf16.mxu1 (!%p177_p3), %vm1276_vm0, %v1275_v1 }
   0x9   : > { %1115 = vmatpush3.bf16.msra.mxu0 (!%p177_p3), %v1236_v2  ;;  %1092 = vmatprep.subr.bf16.mxu1 (!%p177_p3), %v1275_v1 }
   0xa   : > { %1116 = vmatprep.mubr.msk.bf16.mxu0 (!%p177_p3), %vm1276_vm0, %v1275_v1  ;;  %1136 = vmatprep.subr.bf16.mxu0 (!%p177_p3), %v1275_v1 }
   0xe   : > { %s1531_s15 = smov (!%p206_p4, %s1265_s15), 1 }
   0xf   : > { %s1207_s23 = smul.u32 48, %s1531_s15 }
  0x10   : > { %s1208_s9 = smul.u32 36, %s1531_s15 }
  0x11   : > { %s1340_s26 = scalar_lea.vmem %s1521_s0, %s1207_s23 }
  0x12   : > { %v1343_v3 = vld [vmem:[%s1340_s26] sm:$0xff]   ;;  %v1346_v4 = vld [vmem:[%s1340_s26 + $0x8] sm:$0xff]   ;;  %v1360_v12 = vld [vmem:[%s1340_s26 + $0x10] sm:$0xff]   ;;  %s1491_s12 = scalar_lea.vmem %s1525_s4, %s1208_s9 }
  0x13   : > { %v486_v5 = vld [vmem:[%s1340_s26 + $0x4] sm:$0xf]  ;;  %v1350_v6 = vld [vmem:[%s1340_s26 + $0x8] sm:$0xf]  ;;  %v264_v7 = vshrl.u32 %v1343_v3, 16  ;;  %v266_v8 = vshll.u32 %v1343_v3, 16 }
  0x14   : > { %v271_v9 = vshll.u32 %v1346_v4, 16  ;;  %v981_v10 = vcombine.low %v486_v5, %v1350_v6  ;;  %v1357_v11 = vld [vmem:[%s1340_s26 + $0xc] sm:$0xff]   ;;  %v275_v19 = vshrl.u32 %v1346_v4, 16  ;;  %v1368_v20 = vld [vmem:[%s1340_s26 + $0x14] sm:$0xff]   ;;  %v279_v23 = vshll.u32 %v1360_v12, 16  ;;  %v1388_v36 = vld [vmem:[%s1340_s26 + $0x1c] sm:$0xff]  }
  0x15   : > { %v268_v13 = vrot.slane %v266_v8, 1  ;;  %v532_v18 = vshll.u32 %v1357_v11, 16  ;;  %v536_v28 = vshrl.u32 %v1357_v11, 16  ;;  %v540_v29 = vshll.u32 %v1368_v20, 16  ;;  %v1382_v33 = vld [vmem:[%s1340_s26 + $0x18] sm:$0xff]  }
  0x16   : > { %v273_v14 = vrot.slane %v271_v9, 1  ;;  %v525_v15 = vshrl.u32 %v981_v10, 16  ;;  %v527_v16 = vshll.u32 %v981_v10, 16  ;;  %v281_v32 = vrot.slane %v279_v23, 1  ;;  %v1394_v40 = vld [vmem:[%s1340_s26 + $0x20] sm:$0xf] }
  0x17   : > { %v269_v21 = vor.u32 %v268_v13, %v264_v7  ;;  %v534_v24 = vrot.slane %v532_v18, 1  ;;  %v542_v35 = vrot.slane %v540_v29, 1  ;;  %v283_v38 = vshrl.u32 %v1360_v12, 16  ;;  %v233_v41 = vld [vmem:[%s1340_s26 + $0x24] sm:$0x1] }
  0x18   : > { %v529_v22 = vrot.slane %v527_v16, 1  ;;  %v277_v31 = vor.u32 %v275_v19, %v273_v14  ;;  %v287_v39 = vshll.u32 %v1382_v33, 16  ;;  %v544_v43 = vshrl.u32 %v1368_v20, 16  ;;  %v1248_v50 = vld [vmem:[%s1340_s26 + $0x24] sm:$0x1f]  }
  0x19   : > { %v274_v25 = vsel %vm262_vm1, %v269_v21, %v273_v14  ;;  %v538_v34 = vor.u32 %v536_v28, %v534_v24  ;;  %v548_v44 = vshll.u32 %v1388_v36, 16  ;;  %v285_v45 = vor.u32 %v283_v38, %v281_v32  ;;  %v665_v5 = vld [vmem:[%s1340_s26 + $0x4] sm:$0xe]  ;;  %v1476_v19 = vld [vmem:[%s1523_s2] ss:$0 sm:$0xff] }
  0x1a   : > { %v530_v26 = vor.u32 %v529_v22, %v525_v15  ;;  %1073 = vmatmul.mubr.msk.bf16.vlgmr.msra.gmra.mrb[0].mxu1 %vm308_vm2, %v274_v25  ;;  %v282_v37 = vsel %vm262_vm1, %v277_v31, %v281_v32  ;;  %v289_v46 = vrot.slane %v287_v39, 1  ;;  %v965_v47 = vcombine.low %v1394_v40, %v233_v41  ;;  %v1481_v23 = vld [vmem:[%s1524_s3] ss:$0 sm:$0xff] }
  0x1b   : > { %1093 = vmatpush3.bf16.msra.mxu1 %v1239_v17  ;;  %1076 = vmatprep.mubr.msk.bf16.mxu1 %vm1276_vm0, %v1275_v1  ;;  %v543_v42 = vsel %vm262_vm1, %v538_v34, %v542_v35  ;;  %v546_v48 = vor.u32 %v544_v43, %v542_v35  ;;  %v550_v49 = vrot.slane %v548_v44, 1  ;;  %v291_v52 = vshrl.u32 %v1382_v33, 16 }
  0x1c   : > { %v535_v30 = vsel %vm262_vm1, %v530_v26, %v534_v24  ;;  %v290_v51 = vsel %vm262_vm1, %v285_v45, %v289_v46  ;;  %v295_v53 = vshll.u32 %v965_v47, 16  ;;  %v552_v55 = vshrl.u32 %v1388_v36, 16 }
  0x1d   : > { %1117 = vmatmul.mubr.msk.bf16.vlgmr.msra.gmra.mrb[0].mxu0 %vm308_vm2, %v535_v30  ;;  %v551_v54 = vsel %vm262_vm1, %v546_v48, %v550_v49  ;;  %v556_v56 = vshll.u32 %v1248_v50, 16  ;;  %v293_v57 = vor.u32 %v291_v52, %v289_v46  ;;  %v299_v63 = vshrl.u32 %v965_v47, 16 }
  0x1e   : > { %1137 = vmatpush3.bf16.msra.mxu0 %v1242_v27  ;;  %1120 = vmatprep.mubr.msk.bf16.mxu0 %vm1276_vm0, %v1275_v1  ;;  %v297_v58 = vrot.slane %v295_v53, 1  ;;  %v554_v59 = vor.u32 %v552_v55, %v550_v49  ;;  %v560_v0 = vshrl.u32 %v1248_v50, 16  ;;  %v994_v8 = vcombine.low %v665_v5, %v1350_v6 }
  0x1f   : > { %v558_v60 = vrot.slane %v556_v56, 1  ;;  %v674_v10 = vrot.slane %v1357_v11, 1  ;;  %v676_v6 = vrot.slane %v1368_v20, 1 }
  0x20   : > { %v298_v61 = vsel %vm262_vm1, %v293_v57, %v297_v58  ;;  %v301_v2 = vor.u32 %v299_v63, %v297_v58  ;;  %v673_v9 = vrot.slane %v994_v8, 1 }
  0x21   : > { %v559_v62 = vsel %vm262_vm1, %v554_v59, %v558_v60  ;;  %v562_v7 = vor.u32 %v560_v0, %v558_v60  ;;  %v677_v14 = vsel %vm672_vm3, %v674_v10, %v676_v6 }
  0x22   : > { %1077 = vmatmul.mubr.msk.bf16.gmra.mrb[4].mxu1 %vm308_vm2, %v282_v37  ;;  %v675_v13 = vsel %vm672_vm3, %v673_v9, %v674_v10 }
  0x23   : > { %1080 = vmatprep.mubr.msk.bf16.mxu1 %vm1276_vm0, %v1275_v1 }
  0x25   : > { %1121 = vmatmul.mubr.msk.bf16.gmra.mrb[4].mxu0 %vm308_vm2, %v543_v42 }
  0x26   : > { %1124 = vmatprep.mubr.msk.bf16.mxu0 %vm1276_vm0, %v1275_v1 }
  0x2a   : > { %1081 = vmatmul.mubr.msk.bf16.gmra.mrb[8].mxu1 %vm308_vm2, %v290_v51 }
  0x2b   : > { %1084 = vmatprep.mubr.msk.bf16.mxu1 %vm1276_vm0, %v1275_v1 }
  0x2d   : > { %1125 = vmatmul.mubr.msk.bf16.gmra.mrb[8].mxu0 %vm308_vm2, %v551_v54 }
  0x2e   : > { %1128 = vmatprep.mubr.msk.bf16.mxu0 %vm1276_vm0, %v1275_v1 }
  0x32   : > { %1085 = vmatmul.mubr.msk.bf16.gmra.mrb[12].mxu1 %vm308_vm2, %v298_v61 }
  0x33   : > { %1088 = vmatprep.mubr.msk.bf16.mxu1 %vm1276_vm0, %v1275_v1 }
  0x35   : > { %1129 = vmatmul.mubr.msk.bf16.gmra.mrb[12].mxu0 %vm308_vm2, %v559_v62 }
  0x36   : > { %1132 = vmatprep.mubr.msk.bf16.mxu0 %vm1276_vm0, %v1275_v1 }
  0x3a   : > { %1089 = vmatmul.mubr.msk.bf16.gmra.mrb[16].mxu1 %vm308_vm2, %v301_v2 }
  0x3b   : > { %1094 = vmatprep.mubr.msk.bf16.mxu1 %vm1276_vm0, %v1275_v1 }
  0x3d   : > { %1133 = vmatmul.mubr.msk.bf16.gmra.mrb[16].mxu0 %vm308_vm2, %v562_v7 }
  0x3e   : > { %1138 = vmatprep.mubr.msk.bf16.mxu0 %vm1276_vm0, %v1275_v1 }
  0x42   : > { %1095 = vmatmul.mubr.msk.bf16.vlgmr.msra.gmra.mrb[0].mxu1 %vm308_vm2, %v1343_v3  ;;  %v678_v3 = vrot.slane %v1388_v36, 1 }
  0x43   : > { %1098 = vmatprep.mubr.msk.bf16.mxu1 %vm1276_vm0, %v1275_v1 }
  0x44   : > { %v679_v11 = vsel %vm672_vm3, %v676_v6, %v678_v3 }
  0x45   : > { %1139 = vmatmul.mubr.msk.bf16.vlgmr.msra.gmra.mrb[0].mxu0 %vm308_vm2, %v675_v13 }
  0x46   : > { %1142 = vmatprep.mubr.msk.bf16.mxu0 %vm1276_vm0, %v1275_v1 }
  0x4a   : > { %1099 = vmatmul.mubr.msk.bf16.gmra.mrb[4].mxu1 %vm308_vm2, %v1346_v4  ;;  %v680_v4 = vrot.slane %v1248_v50, 1 }
  0x4b   : > { %1102 = vmatprep.mubr.msk.bf16.mxu1 %vm1276_vm0, %v1275_v1 }
  0x4c   : > { %v681_v15 = vsel %vm672_vm3, %v678_v3, %v680_v4 }
  0x4d   : > { %1143 = vmatmul.mubr.msk.bf16.gmra.mrb[4].mxu0 %vm308_vm2, %v677_v14 }
  0x4e   : > { %1146 = vmatprep.mubr.msk.bf16.mxu0 %vm1276_vm0, %v1275_v1 }
  0x52   : > { %1103 = vmatmul.mubr.msk.bf16.gmra.mrb[8].mxu1 %vm308_vm2, %v1360_v12  ;;  %v972_v12 = vcombine.low %v1394_v40, %v1394_v40 }
  0x53   : > { %1106 = vmatprep.mubr.msk.bf16.mxu1 %vm1276_vm0, %v1275_v1 }
  0x55   : > { %1147 = vmatmul.mubr.msk.bf16.gmra.mrb[8].mxu0 %vm308_vm2, %v679_v11 }
  0x56   : > { %1150 = vmatprep.mubr.msk.bf16.mxu0 %vm1276_vm0, %v1275_v1 }
  0x5a   : > { %1107 = vmatmul.mubr.msk.bf16.gmra.mrb[12].mxu1 %vm308_vm2, %v1382_v33 }
  0x5b   : > { %1110 = vmatprep.mubr.msk.bf16.mxu1 %vm1276_vm0, %v1275_v1 }
  0x5d   : > { %1151 = vmatmul.mubr.msk.bf16.gmra.mrb[12].mxu0 %vm308_vm2, %v681_v15 }
  0x5e   : > { %1154 = vmatprep.mubr.msk.bf16.mxu0 %vm1276_vm0, %v1275_v1 }
  0x62   : > { %1111 = vmatmul.mubr.msk.bf16.gmra.mrb[16].mxu1 %vm308_vm2, %v972_v12 }
  0x65   : > { %1155 = vmatmul.mubr.msk.bf16.gmra.mrb[16].mxu0 %vm308_vm2, %v680_v4 }
 0x115   : > { %v448_v16 = vpop.f32.mrb[0].mxu1 }
 0x116   : > { %v1096_v17 = vpop.f32.mrb[1].mxu1 }
 0x117   : > { %v451_v20 = vpop.f32.mrb[2].mxu1 }
 0x118   : > { %v737_v18 = vpop.f32.mrb[0].mxu0  ;;  %v1097_v1 = vpop.f32.mrb[3].mxu1 }
 0x119   : > { %v1158_v21 = vadd.f32 %v737_v18, %v448_v16  ;;  %v1140_v22 = vpop.f32.mrb[1].mxu0 }
 0x11a   : > { %v740_v24 = vpop.f32.mrb[2].mxu0 }
 0x11b   : > { %v791_v25 = vmul.f32 %v1158_v21, %v1476_v19  ;;  %v1159_v26 = vadd.f32 %v740_v24, %v451_v20  ;;  %v1141_v27 = vpop.f32.mrb[3].mxu0 }
 0x11d   : > { %v807_v28 = vadd.f32 %v1481_v23, %v791_v25  ;;  %v792_v29 = vmul.f32 %v1159_v26, %v1476_v19  ;;  %v456_v30 = vpop.f32.mrb[4].mxu1 }
 0x11e   : > { %v1100_v32 = vpop.f32.mrb[5].mxu1 }
 0x11f   : > { %v808_v31 = vadd.f32 %v1481_v23, %v792_v29  ;;  %v459_v34 = vpop.f32.mrb[6].mxu1  ;;  %v816_v35 = vmax.f32 %v807_v28, 0.0 }
 0x120   : > { %v745_v33 = vpop.f32.mrb[4].mxu0  ;;  %v1101_v39 = vpop.f32.mrb[7].mxu1 }
 0x121   : > { %v817_v36 = vmax.f32 %v808_v31, 0.0  ;;  %v1160_v37 = vadd.f32 %v745_v33, %v456_v30  ;;  %v1144_v38 = vpop.f32.mrb[5].mxu0 }
 0x122   : > { %v748_v40 = vpop.f32.mrb[6].mxu0 }
 0x123   : > { %v1026_v41 = vpack.c.bf16 %v817_v36, %v816_v35  ;;  %v793_v42 = vmul.f32 %v1160_v37, %v1476_v19  ;;  %v1161_v43 = vadd.f32 %v748_v40, %v459_v34  ;;  %v1145_v44 = vpop.f32.mrb[7].mxu0 }
 0x125   : > { %1027 = vst [vmem:[%s1491_s12] sm:$0xff] %v1026_v41   ;;  %v809_v45 = vadd.f32 %v1481_v23, %v793_v42  ;;  %v794_v46 = vmul.f32 %v1161_v43, %v1476_v19  ;;  %v464_v47 = vpop.f32.mrb[8].mxu1 }
 0x126   : > { %v1104_v49 = vpop.f32.mrb[9].mxu1 }
 0x127   : > { %v810_v48 = vadd.f32 %v1481_v23, %v794_v46  ;;  %v467_v51 = vpop.f32.mrb[10].mxu1  ;;  %v818_v52 = vmax.f32 %v809_v45, 0.0 }
 0x128   : > { %v753_v50 = vpop.f32.mrb[8].mxu0  ;;  %v1105_v56 = vpop.f32.mrb[11].mxu1 }
 0x129   : > { %v819_v53 = vmax.f32 %v810_v48, 0.0  ;;  %v1162_v54 = vadd.f32 %v753_v50, %v464_v47  ;;  %v1148_v55 = vpop.f32.mrb[9].mxu0 }
 0x12a   : > { %v756_v57 = vpop.f32.mrb[10].mxu0 }
 0x12b   : > { %v1031_v58 = vpack.c.bf16 %v819_v53, %v818_v52  ;;  %v795_v59 = vmul.f32 %v1162_v54, %v1476_v19  ;;  %v1163_v60 = vadd.f32 %v756_v57, %v467_v51  ;;  %v1149_v61 = vpop.f32.mrb[11].mxu0 }
 0x12d   : > { %1043 = vst [vmem:[%s1491_s12 + $0x8] sm:$0xff] %v1031_v58   ;;  %v811_v62 = vadd.f32 %v1481_v23, %v795_v59  ;;  %v796_v63 = vmul.f32 %v1163_v60, %v1476_v19  ;;  %v472_v0 = vpop.f32.mrb[12].mxu1 }
 0x12e   : > { %v1108_v5 = vpop.f32.mrb[13].mxu1 }
 0x12f   : > { %v812_v2 = vadd.f32 %v1481_v23, %v796_v63  ;;  %v475_v8 = vpop.f32.mrb[14].mxu1  ;;  %v820_v9 = vmax.f32 %v811_v62, 0.0 }
 0x130   : > { %v761_v7 = vpop.f32.mrb[12].mxu0  ;;  %v1109_v14 = vpop.f32.mrb[15].mxu1 }
 0x131   : > { %v821_v10 = vmax.f32 %v812_v2, 0.0  ;;  %v1164_v13 = vadd.f32 %v761_v7, %v472_v0  ;;  %v1152_v6 = vpop.f32.mrb[13].mxu0 }
 0x132   : > { %v764_v3 = vpop.f32.mrb[14].mxu0 }
 0x133   : > { %v1036_v11 = vpack.c.bf16 %v821_v10, %v820_v9  ;;  %v797_v4 = vmul.f32 %v1164_v13, %v1476_v19  ;;  %v1165_v15 = vadd.f32 %v764_v3, %v475_v8  ;;  %v1153_v12 = vpop.f32.mrb[15].mxu0 }
 0x135   : > { %1044 = vst [vmem:[%s1491_s12 + $0x10] sm:$0xff] %v1036_v11   ;;  %v813_v16 = vadd.f32 %v1481_v23, %v797_v4  ;;  %v798_v17 = vmul.f32 %v1165_v15, %v1476_v19  ;;  %v480_v18 = vpop.f32.mrb[16].mxu1 }
 0x136   : > { %v1112_v21 = vpop.f32.mrb[17].mxu1 }
 0x137   : > { %v814_v20 = vadd.f32 %v1481_v23, %v798_v17  ;;  %v483_v1 = vpop.f32.mrb[18].mxu1  ;;  %v822_v24 = vmax.f32 %v813_v16, 0.0 }
 0x138   : > { %v769_v22 = vpop.f32.mrb[16].mxu0  ;;  %v1113_v28 = vpop.f32.mrb[19].mxu1 }
 0x139   : > { %v823_v25 = vmax.f32 %v814_v20, 0.0  ;;  %v1166_v26 = vadd.f32 %v769_v22, %v480_v18  ;;  %v1156_v27 = vpop.f32.mrb[17].mxu0 }
 0x13a   : > { %v772_v29 = vpop.f32.mrb[18].mxu0 }
 0x13b   : > { %v1041_v30 = vpack.c.bf16 %v823_v25, %v822_v24  ;;  %v799_v31 = vmul.f32 %v1166_v26, %v1476_v19  ;;  %v1157_v32 = vpop.f32.mrb[19].mxu0 }
 0x13d   : > { %1045 = vst [vmem:[%s1491_s12 + $0x18] sm:$0xff] %v1041_v30   ;;  %v815_v33 = vadd.f32 %v1481_v23, %v799_v31 }
 0x13f   : > { %v824_v34 = vmax.f32 %v815_v33, 0.0 }
 0x141   : > { %v1022_v35 = vpack.c.bf16 %v824_v34, %v824_v34 }
 0x143   : > { %870 = vst [vmem:[%s1491_s12 + $0x20] sm:$0xf] %v1022_v35 }
 0x144 PF: > { %s14_s17 = sadd.s32 1, %s1273_s17   ;;  %s1526_s15 = smov %s1269_s16 }
 0x145   : > { %p11_p5 = scmp.ge.s32.totalorder %s14_s17, 4   ;;  %s1527_s16 = smov %s1529_s18 }
 0x147   :  { %13 = sbr.rel (!%p11_p5) target bundleno = 2 (0x2), region = 69 }

// kernel: basic_block_forward.3
= control target key start
LH: loop header
LB: loop body
LE: loop exit
PB: predicated region body
PF: predicated region fallthrough
CT: control target
= control target key end

     0   :  { %s3462_s27 = smov 0   ;;  %s3464_s28 = smov 0   ;;  %s4214_s0 = inlined_call_operand.vmem [shape: bf16[2,110,128], index: 0, kind: input, shape index: {}]   ;;  %s4215_s1 = inlined_call_operand.vmem [shape: bf16[9,128,128], index: 1, kind: input, shape index: {}]   ;;  %s4216_s2 = inlined_call_operand.vmem [shape: f32[1,128], index: 2, kind: input, shape index: {}]   ;;  %s4217_s3 = inlined_call_operand.vmem [shape: f32[1,128], index: 3, kind: input, shape index: {}]   ;;  %s4218_s4 = inlined_call_operand.vmem [shape: bf16[2,80,4], index: 4, kind: input, shape index: {}]   ;;  %s4219_s5 = inlined_call_operand.vmem [shape: bf16[4,128], index: 5, kind: input, shape index: {}]   ;;  %s4220_s6 = inlined_call_operand.vmem [shape: f32[1,128], index: 6, kind: input, shape index: {}]   ;;  %s4221_s7 = inlined_call_operand.vmem [shape: f32[1,128], index: 7, kind: input, shape index: {}]   ;;  %s4222_s8 = inlined_call_operand.vmem [shape: f32[2,80,128], index: 8, kind: output, shape index: {}]  }
   0x1   :  { %s3466_s29 = smov 0  }
   0x2 LB: > { %s30_s30 = sadd.s32 1, %s3409_s28  ;;  %p2400_p0 = scmp.ge.s32.totalorder %s3413_s29, 1  ;;  %s3413_s29 = sphi %s3466_s29, %s18_s29   ;;  %s3409_s28 = sphi %s3464_s28, %s4224_s28   ;;  %s3405_s27 = sphi %s3462_s27, %s4223_s27  }
   0x3   : > { %p32_p1 = scmp.ge.s32.totalorder %s30_s30, 2  ;;  %p293_p2 = scmp.lt.s32.totalorder %s3413_s29, 3 }
   0x5   : > { %s4226_s30 = smov (%p32_p1, %s30_s30), 0  ;;  %p294_p3 = pnand %p2400_p0, %p293_p2 }
   0x6   : > { %v3291_v0 = vld [vmem:[%s4215_s1 + $0x40] sm:$0xff] (!%p294_p3)   ;;  %v3415_v1 = vmov (!%p294_p3), 0.0   ;;  %v3293_v3 = vld [vmem:[%s4215_s1 + $0x48] sm:$0xff] (!%p294_p3)   ;;  %vm3416_vm0 = vmmov (!%p294_p3), 0   ;;  %p340_p4 = scmp.lt.s32.totalorder (!%p294_p3), %s3405_s27, 1  ;;  %v3295_v5 = vld [vmem:[%s4215_s1 + $0x50] sm:$0xff] (!%p294_p3)  }
   0x7   : > { %297 = sbr.rel (%p294_p3) target bundleno = 457 (0x1c9), region = 52  ;;  %2766 = vmatprep.subr.bf16.mxu1 (!%p294_p3), %v3415_v1  ;;  %2910 = vmatprep.subr.bf16.mxu0 (!%p294_p3), %v3415_v1  ;;  %v3292_v2 = vld [vmem:[%s4215_s1 + $0x100] sm:$0xff] (!%p294_p3)   ;;  %v3294_v4 = vld [vmem:[%s4215_s1 + $0x108] sm:$0xff] (!%p294_p3)   ;;  %v3296_v6 = vld [vmem:[%s4215_s1 + $0x110] sm:$0xff] (!%p294_p3)   ;;  %vm438_vm1 = vsmask.f32 (!%p294_p3), 7424 }
   0x8   : > { %2767 = vmatpush3.bf16.msra.mxu1 (!%p294_p3), %v3291_v0  ;;  %2782 = vmatprep.mubr.msk.bf16.mxu1 (!%p294_p3), %vm3416_vm0, %v3415_v1  ;;  %v3297_v7 = vld [vmem:[%s4215_s1 + $0x58] sm:$0xff] (!%p294_p3)   ;;  %v3299_v9 = vld [vmem:[%s4215_s1 + $0x60] sm:$0xff] (!%p294_p3)   ;;  %v3301_v11 = vld [vmem:[%s4215_s1 + $0x68] sm:$0xff] (!%p294_p3)   ;;  %vm1128_vm2 = vsmask.f32 (!%p294_p3), 6400  ;;  %vm756_vm3 = vcmask (!%p294_p3), 1046528  }
   0x9   : > { %2911 = vmatpush3.bf16.msra.mxu0 (!%p294_p3), %v3292_v2  ;;  %2768 = vmatprep.subr.bf16.mxu1 (!%p294_p3), %v3415_v1  ;;  %v3298_v8 = vld [vmem:[%s4215_s1 + $0x118] sm:$0xff] (!%p294_p3)   ;;  %v3300_v10 = vld [vmem:[%s4215_s1 + $0x120] sm:$0xff] (!%p294_p3)   ;;  %v3302_v19 = vld [vmem:[%s4215_s1 + $0x128] sm:$0xff] (!%p294_p3)   ;;  %vm1339_vm4 = vcmask (!%p294_p3), 1045504   ;;  %vm1922_vm5 = vcmask (!%p294_p3), 1044480   ;;  %vm2156_vm7 = vcmask (!%p294_p3), 1041408  }
   0xa   : > { %2912 = vmatprep.subr.bf16.mxu0 (!%p294_p3), %v3415_v1  ;;  %2926 = vmatprep.mubr.msk.bf16.mxu0 (!%p294_p3), %vm3416_vm0, %v3415_v1  ;;  %v3303_v22 = vld [vmem:[%s4215_s1 + $0x70] sm:$0xff] (!%p294_p3)   ;;  %v3305_v35 = vld [vmem:[%s4215_s1 + $0x78] sm:$0xff] (!%p294_p3)   ;;  %v3312_v43 = vld [vmem:[%s4215_s1] sm:$0xff] (!%p294_p3)   ;;  %vm1711_vm6 = vsmask.f32 (!%p294_p3), 5376  ;;  %vm2140_vm8 = vcmask (!%p294_p3), 31744  }
   0xb   : > { %v3304_v25 = vld [vmem:[%s4215_s1 + $0x130] sm:$0xff] (!%p294_p3)   ;;  %v3306_v36 = vld [vmem:[%s4215_s1 + $0x138] sm:$0xff] (!%p294_p3)   ;;  %v3311_v50 = vld [vmem:[%s4215_s1 + $0x140] sm:$0xff] (!%p294_p3)  }
   0xc   : > { %2769 = vmatpush3.bf16.msra.mxu1 (!%p294_p3), %v3293_v3  ;;  %v3313_v54 = vld [vmem:[%s4215_s1 + $0x148] sm:$0xff] (!%p294_p3)   ;;  %v3317_v62 = vld [vmem:[%s4215_s1 + $0x150] sm:$0xff] (!%p294_p3)  }
   0xd   : > { %2913 = vmatpush3.bf16.msra.mxu0 (!%p294_p3), %v3294_v4  ;;  %2770 = vmatprep.subr.bf16.mxu1 (!%p294_p3), %v3415_v1  ;;  %v3315_v55 = vld [vmem:[%s4215_s1 + $0x8] sm:$0xff] (!%p294_p3)   ;;  %v3318_v63 = vld [vmem:[%s4215_s1 + $0x10] sm:$0xff] (!%p294_p3)  }
   0xe   : > { %s4228_s27 = smov (!%p340_p4, %s3405_s27), 1  ;;  %2914 = vmatprep.subr.bf16.mxu0 %v3415_v1 }
   0xf   : > { %s3262_s21 = smul.u32 56, %s4228_s27 }
  0x10   : > { %2771 = vmatpush3.bf16.msra.mxu1 %v3295_v5  ;;  %s3263_s15 = smul.u32 40, %s4228_s27 }
  0x11   : > { %2915 = vmatpush3.bf16.msra.mxu0 %v3296_v6  ;;  %2772 = vmatprep.subr.bf16.mxu1 %v3415_v1  ;;  %s3522_s10 = scalar_lea.vmem %s4214_s0, %s3262_s21  ;;  %s3264_s18 = smul.u32 80, %s4228_s27 }
  0x12   : > { %2916 = vmatprep.subr.bf16.mxu0 %v3415_v1  ;;  %v366_v12 = vld [vmem:[%s3522_s10] sm:$0xf]  ;;  %v3537_v13 = vld [vmem:[%s3522_s10 + $0x4] sm:$0xf]  ;;  %v3543_v15 = vld [vmem:[%s3522_s10 + $0x8] sm:$0xff]   ;;  %s3840_s22 = scalar_lea.vmem %s4218_s4, %s3263_s15 }
  0x13   : > { %v3540_v14 = vcombine.low %v366_v12, %v3537_v13  ;;  %v3546_v16 = vld [vmem:[%s3522_s10 + $0xc] sm:$0xff]   ;;  %v904_v17 = vld [vmem:[%s3522_s10 + $0x4] sm:$0xe]  ;;  %v3550_v18 = vld [vmem:[%s3522_s10 + $0x8] sm:$0xf]  ;;  %v447_v30 = vshll.u32 %v3543_v15, 16  ;;  %s4155_s21 = scalar_lea.vmem %s4222_s8, %s3264_s18 }
  0x14   : > { %2773 = vmatpush3.bf16.msra.mxu1 %v3297_v7  ;;  %v3558_v21 = vcombine.low %v904_v17, %v3550_v18  ;;  %v1138_v23 = vshrl.u32 %v3546_v16, 16  ;;  %v1141_v24 = vshll.u32 %v3546_v16, 16  ;;  %v3582_v39 = vld [vmem:[%s3522_s10 + $0x10] sm:$0xff]   ;;  %v451_v47 = vshrl.u32 %v3543_v15, 16  ;;  %v3603_v53 = vld [vmem:[%s3522_s10 + $0x1c] sm:$0xff]   ;;  %v3633_v4 = vld [vmem:[%s3522_s10 + $0x24] sm:$0xff]  }
  0x15   : > { %2917 = vmatpush3.bf16.msra.mxu0 %v3298_v8  ;;  %2774 = vmatprep.subr.bf16.mxu1 %v3415_v1  ;;  %v442_v20 = vshll.u32 %v3540_v14, 16  ;;  %v440_v26 = vshrl.u32 %v3540_v14, 16  ;;  %v449_v38 = vrot.slane %v447_v30, 1  ;;  %v3586_v42 = vld [vmem:[%s3522_s10 + $0x14] sm:$0xff]   ;;  %v455_v48 = vshll.u32 %v3582_v39, 16 }
  0x16   : > { %2918 = vmatprep.subr.bf16.mxu0 %v3415_v1  ;;  %v1130_v27 = vshrl.u32 %v3558_v21, 16  ;;  %v1133_v28 = vshll.u32 %v3558_v21, 16  ;;  %v1140_v33 = vrot.slane %v1138_v23, 1  ;;  %v1143_v34 = vrot.slane %v1141_v24, 2  ;;  %v3613_v58 = vld [vmem:[%s3522_s10 + $0x18] sm:$0xff]   ;;  %v3324_v23 = vld [vmem:[%s4215_s1 + $0x20] sm:$0xff]  }
  0x17   : > { %v444_v29 = vrot.slane %v442_v20, 1  ;;  %v1147_v44 = vshrl.u32 %v3586_v42, 16  ;;  %v1150_v45 = vshll.u32 %v3586_v42, 16  ;;  %v453_v56 = vor.u32 %v451_v47, %v449_v38  ;;  %v3667_v30 = vld [vmem:[%s3522_s10 + $0x28] ss:$0 sps:$4 sm:$0x11]  }
  0x18   : > { %2775 = vmatpush3.bf16.msra.mxu1 %v3299_v9  ;;  %v1132_v31 = vrot.slane %v1130_v27, 1  ;;  %v1135_v32 = vrot.slane %v1133_v28, 2  ;;  %v1144_v41 = vor.u32 %v1143_v34, %v1140_v33  ;;  %v457_v57 = vrot.slane %v455_v48, 1 }
  0x19   : > { %2919 = vmatpush3.bf16.msra.mxu0 %v3300_v10  ;;  %2776 = vmatprep.subr.bf16.mxu1 %v3415_v1  ;;  %v445_v37 = vor.u32 %v444_v29, %v440_v26  ;;  %v1149_v51 = vrot.slane %v1147_v44, 1  ;;  %v1152_v52 = vrot.slane %v1150_v45, 2  ;;  %v1156_v60 = vshrl.u32 %v3603_v53, 16  ;;  %v3322_v10 = vld [vmem:[%s4215_s1 + $0x18] sm:$0xff]   ;;  %v3329_v45 = vld [vmem:[%s4215_s1 + $0x170] sm:$0xff]  }
  0x1a   : > { %2920 = vmatprep.subr.bf16.mxu0 %v3415_v1  ;;  %v1136_v40 = vor.u32 %v1135_v32, %v1132_v31  ;;  %v1159_v61 = vshll.u32 %v3603_v53, 16  ;;  %v459_v0 = vshrl.u32 %v3582_v39, 16  ;;  %v458_v2 = vsel %vm438_vm1, %v453_v56, %v457_v57  ;;  %v3670_v31 = vld [vmem:[%s3522_s10 + $0x2c] ss:$0 sps:$4 sm:$0x33]  }
  0x1b   : > { %v450_v46 = vsel %vm438_vm1, %v445_v37, %v449_v38  ;;  %v1153_v59 = vor.u32 %v1152_v52, %v1149_v51  ;;  %v463_v3 = vshll.u32 %v3613_v58, 16  ;;  %v1158_v6 = vrot.slane %v1156_v60, 1  ;;  %v3327_v32 = vld [vmem:[%s4215_s1 + $0x168] sm:$0xff]   ;;  %v3332_v51 = vld [vmem:[%s4215_s1 + $0x30] sm:$0xff]  }
  0x1c   : > { %2777 = vmatpush3.bf16.msra.mxu1 %v3301_v11  ;;  %v1145_v49 = vsel %vm1128_vm2, %v1136_v40, %v1144_v41  ;;  %v1161_v7 = vrot.slane %v1159_v61, 2  ;;  %v461_v8 = vor.u32 %v459_v0, %v457_v57  ;;  %v3642_v11 = vld [vmem:[%s3522_s10 + $0x20] sm:$0xff]   ;;  %v1165_v12 = vshrl.u32 %v3633_v4, 16 }
  0x1d   : > { %2921 = vmatpush3.bf16.msra.mxu0 %v3302_v19  ;;  %2778 = vmatprep.subr.bf16.mxu1 %v3415_v1  ;;  %v1154_v5 = vsel %vm1128_vm2, %v1144_v41, %v1153_v59  ;;  %v465_v9 = vrot.slane %v463_v3, 1  ;;  %v3321_v19 = vld [vmem:[%s4215_s1 + $0x158] sm:$0xff]   ;;  %v1168_v20 = vshll.u32 %v3633_v4, 16  ;;  %v467_v24 = vshrl.u32 %v3613_v58, 16  ;;  %v1318_v57 = vld [vmem:[%s3522_s10 + $0x4] sm:$0xc] }
  0x1e   : > { %2922 = vmatprep.subr.bf16.mxu0 %v3415_v1  ;;  %v1162_v17 = vor.u32 %v1161_v7, %v1158_v6  ;;  %v471_v26 = vshll.u32 %v3642_v11, 16  ;;  %v1167_v27 = vrot.slane %v1165_v12, 1  ;;  %v1174_v37 = vshrl.u32 %v3670_v31, 16 }
  0x1f   : > { %v1170_v29 = vrot.slane %v1168_v20, 2  ;;  %v469_v33 = vor.u32 %v467_v24, %v465_v9  ;;  %v1177_v38 = vshll.u32 %v3670_v31, 16  ;;  %v758_v40 = vrot.slane %v3543_v15, 1 }
  0x20   : > { %2779 = vmatpush3.bf16.msra.mxu1 %v3303_v22  ;;  %v3323_v22 = vld [vmem:[%s4215_s1 + $0x160] sm:$0xff]   ;;  %v1163_v28 = vsel %vm1128_vm2, %v1153_v59, %v1162_v17  ;;  %v473_v34 = vrot.slane %v471_v26, 1  ;;  %v760_v41 = vrot.slane %v3582_v39, 1  ;;  %v960_v52 = vrot.slane %v3558_v21, 1  ;;  %v3333_v21 = vld [vmem:[%s4215_s1 + $0x178] sm:$0xff]   ;;  %v3340_v26 = vld [vmem:[%s4215_s1 + $0x190] sm:$0xff]  }
  0x21   : > { %2923 = vmatpush3.bf16.msra.mxu0 %v3304_v25  ;;  %2780 = vmatprep.subr.bf16.mxu1 %v3415_v1  ;;  %v466_v25 = vsel %vm438_vm1, %v461_v8, %v465_v9  ;;  %v963_v61 = vrot.slane %v3586_v42, 1  ;;  %v2538_v7 = vcombine.low %v1318_v57, %v3550_v18  ;;  %v735_v8 = vld [vmem:[%s3522_s10] sm:$0xe]  ;;  %v1343_v24 = vrot.slane %v3586_v42, 2  ;;  %v3343_v42 = vld [vmem:[%s4215_s1 + $0x98] sm:$0xff]  }
  0x22   : > { %2924 = vmatprep.subr.bf16.mxu0 %v3415_v1  ;;  %v474_v44 = vsel %vm438_vm1, %v469_v33, %v473_v34  ;;  %v3698_v47 = vsel %vm756_vm3, %v758_v40, %v760_v41  ;;  %v3346_v33 = vld [vmem:[%s4215_s1 + $0x1a8] sm:$0xff]  }
  0x23   : > { %v1340_v18 = vrot.slane %v2538_v7, 2 }
  0x24   : > { %2781 = vmatpush3.bf16.msra.mxu1 %v3305_v35  ;;  %v3328_v35 = vld [vmem:[%s4215_s1 + $0x28] sm:$0xff]  }
  0x25   : > { %2925 = vmatpush3.bf16.msra.mxu0 %v3306_v36  ;;  %2802 = vmatprep.subr.bf16.mxu1 %v3415_v1  ;;  %v1171_v36 = vor.u32 %v1170_v29, %v1167_v27  ;;  %v1345_v27 = vrot.slane %v3603_v53, 2 }
  0x26   : > { %2946 = vmatprep.subr.bf16.mxu0 %v3415_v1 }
  0x27   : > { %2783 = vmatmul.mubr.bf16.vlgmr.msra.gmra.mrb[0].mxu1 %v450_v46  ;;  %v475_v46 = vshrl.u32 %v3642_v11, 16  ;;  %v1172_v48 = vsel %vm1128_vm2, %v1162_v17, %v1171_v36  ;;  %v1341_v17 = vrot.slane %v3546_v16, 2  ;;  %v1346_v29 = vsel %vm1339_vm4, %v1343_v24, %v1345_v27 }
  0x28   : > { %2927 = vmatmul.mubr.bf16.vlgmr.msra.gmra.mrb[0].mxu0 %v1145_v49  ;;  %2803 = vmatpush3.bf16.msra.mxu1 %v3312_v43  ;;  %v479_v43 = vshll.u32 %v3667_v30, 16  ;;  %v1176_v49 = vrot.slane %v1174_v37, 1  ;;  %v1349_v37 = vrot.slane %v3670_v31, 2  ;;  %v3845_v31 = vld [vmem:[%s3522_s10 + $0x20] sm:$0xff]  }
  0x29   : > { %2947 = vmatpush3.bf16.msra.mxu0 %v3311_v50  ;;  %2786 = vmatprep.mubr.msk.bf16.mxu1 %vm3416_vm0, %v3415_v1  ;;  %v1179_v50 = vrot.slane %v1177_v38, 2  ;;  %v477_v56 = vor.u32 %v475_v46, %v473_v34  ;;  %v1342_v20 = vsel %vm1339_vm4, %v1340_v18, %v1341_v17  ;;  %v3347_v34 = vld [vmem:[%s4215_s1 + $0xa8] sm:$0xff]   ;;  %v3349_v38 = vld [vmem:[%s4215_s1 + $0xb0] sm:$0xff]   ;;  %v3355_v18 = vld [vmem:[%s4215_s1 + $0x1c0] sm:$0xff]  }
  0x2a   : > { %2948 = vmatprep.subr.bf16.mxu0 %v3415_v1  ;;  %2804 = vmatprep.subr.bf16.mxu1 %v3415_v1 }
  0x2b   : > { %2930 = vmatprep.mubr.msk.bf16.mxu0 %vm3416_vm0, %v3415_v1  ;;  %v1180_v59 = vor.u32 %v1179_v50, %v1176_v49 }
  0x2c   : > { %2805 = vmatpush3.bf16.msra.mxu1 %v3315_v55  ;;  %v961_v55 = vrot.slane %v3546_v16, 1  ;;  %v3339_v16 = vld [vmem:[%s4215_s1 + $0x88] sm:$0xff]  }
  0x2d   : > { %2949 = vmatpush3.bf16.msra.mxu0 %v3313_v54  ;;  %2806 = vmatprep.subr.bf16.mxu1 %v3415_v1  ;;  %v481_v54 = vrot.slane %v479_v43, 1  ;;  %v1181_v6 = vsel %vm1128_vm2, %v1171_v36, %v1180_v59  ;;  %v3382_v36 = vld [vmem:[%s3522_s10 + $0x2c] ss:$0 sps:$4 sm:$0x11]   ;;  %v3831_v43 = vld [vmem:[%s3522_s10 + $0x10] sm:$0xff]  }
  0x2e   : > { %2950 = vmatprep.subr.bf16.mxu0 %v3415_v1  ;;  %v3717_v60 = vsel %vm756_vm3, %v960_v52, %v961_v55  ;;  %v3727_v0 = vsel %vm756_vm3, %v961_v55, %v963_v61  ;;  %v969_v46 = vrot.slane %v3382_v36, 1  ;;  %v3860_v55 = vld [vmem:[%s3522_s10 + $0x28] sm:$0xff]   ;;  %v3373_v36 = vld [vmem:[%s4215_s1 + $0x1f8] sm:$0xff]  }
  0x2f   : > { %2787 = vmatmul.mubr.bf16.gmra.mrb[4].mxu1 %v458_v2  ;;  %v967_v2 = vrot.slane %v3633_v4, 1  ;;  %v482_v3 = vsel %vm438_vm1, %v477_v56, %v481_v54  ;;  %v1487_v54 = vld [vmem:[%s3522_s10 + $0x8] sm:$0xc]  ;;  %v1928_v56 = vrot.slane %v3845_v31, 3 }
  0x30   : > { %2931 = vmatmul.mubr.bf16.gmra.mrb[4].mxu0 %v1154_v5  ;;  %2807 = vmatpush3.bf16.msra.mxu1 %v3318_v63  ;;  %v965_v63 = vrot.slane %v3603_v53, 1  ;;  %v3345_v53 = vld [vmem:[%s4215_s1 + $0xa0] sm:$0xff]  }
  0x31   : > { %2951 = vmatpush3.bf16.msra.mxu0 %v3317_v62  ;;  %2790 = vmatprep.mubr.msk.bf16.mxu1 %vm3416_vm0, %v3415_v1  ;;  %v3334_v62 = vld [vmem:[%s4215_s1 + $0x38] sm:$0xff]   ;;  %v3852_v49 = vsel %vm756_vm3, %v967_v2, %v969_v46 }
  0x32   : > { %2934 = vmatprep.mubr.msk.bf16.mxu0 %vm3416_vm0, %v3415_v1  ;;  %2952 = vmatprep.subr.bf16.mxu0 %v3415_v1  ;;  %v3732_v5 = vsel %vm756_vm3, %v963_v61, %v965_v63  ;;  %v3740_v9 = vsel %vm756_vm3, %v965_v63, %v967_v2 }
  0x33   : > { %2808 = vmatprep.subr.bf16.mxu1 %v3415_v1 }
  0x34   : > { %2809 = vmatpush3.bf16.msra.mxu1 %v3322_v10  ;;  %v2458_v10 = vcombine.low %v735_v8, %v3537_v13  ;;  %v3337_v13 = vld [vmem:[%s4215_s1 + $0x80] sm:$0xff]   ;;  %v1544_v8 = vrot.slane %v3831_v43, 2 }
  0x35   : > { %2953 = vmatpush3.bf16.msra.mxu0 %v3321_v19  ;;  %2810 = vmatprep.subr.bf16.mxu1 %v3415_v1 }
  0x36   : > { %2954 = vmatprep.subr.bf16.mxu0 %v3415_v1  ;;  %v757_v12 = vrot.slane %v2458_v10, 1  ;;  %v3356_v10 = vld [vmem:[%s4215_s1 + $0xc0] sm:$0xff]  }
  0x37   : > { %2791 = vmatmul.mubr.bf16.gmra.mrb[8].mxu1 %v466_v25  ;;  %v1344_v25 = vsel %vm1339_vm4, %v1341_v17, %v1343_v24  ;;  %v3358_v17 = vld [vmem:[%s4215_s1 + $0xc8] sm:$0xff]   ;;  %v3364_v24 = vld [vmem:[%s4215_s1 + $0xd8] sm:$0xff]  }
  0x38   : > { %2935 = vmatmul.mubr.bf16.gmra.mrb[8].mxu0 %v1163_v28  ;;  %2794 = vmatprep.mubr.msk.bf16.mxu1 %vm3416_vm0, %v3415_v1  ;;  %v3751_v19 = vsel %vm756_vm3, %v757_v12, %v758_v40  ;;  %v3342_v28 = vld [vmem:[%s4215_s1 + $0x198] sm:$0xff]   ;;  %v1488_v40 = vld [vmem:[%s3522_s10 + $0xc] sm:$0xf] }
  0x39   : > { %2955 = vmatpush3.bf16.msra.mxu0 %v3323_v22  ;;  %2811 = vmatpush3.bf16.msra.mxu1 %v3324_v23  ;;  %v3336_v22 = vld [vmem:[%s4215_s1 + $0x180] sm:$0xff]   ;;  %v3338_v23 = vld [vmem:[%s4215_s1 + $0x188] sm:$0xff]  }
  0x3a   : > { %2938 = vmatprep.mubr.msk.bf16.mxu0 %vm3416_vm0, %v3415_v1  ;;  %2956 = vmatprep.subr.bf16.mxu0 %v3415_v1 }
  0x3b   : > { %2812 = vmatprep.subr.bf16.mxu1 %v3415_v1 }
  0x3d   : > { %2957 = vmatpush3.bf16.msra.mxu0 %v3327_v32  ;;  %2813 = vmatpush3.bf16.msra.mxu1 %v3328_v35  ;;  %v1347_v32 = vrot.slane %v3633_v4, 2  ;;  %v3348_v35 = vld [vmem:[%s4215_s1 + $0x1b0] sm:$0xff]   ;;  %v3350_v4 = vld [vmem:[%s4215_s1 + $0x1b8] sm:$0xff]  }
  0x3e   : > { %2958 = vmatprep.subr.bf16.mxu0 %v3415_v1  ;;  %2814 = vmatprep.subr.bf16.mxu1 %v3415_v1 }
  0x3f   : > { %2795 = vmatmul.mubr.bf16.gmra.mrb[12].mxu1 %v474_v44  ;;  %v1348_v44 = vsel %vm1339_vm4, %v1345_v27, %v1347_v32  ;;  %v3368_v27 = vld [vmem:[%s4215_s1 + $0x1e8] sm:$0xff]  }
  0x40   : > { %2939 = vmatmul.mubr.bf16.gmra.mrb[12].mxu0 %v1172_v48  ;;  %2798 = vmatprep.mubr.msk.bf16.mxu1 %vm3416_vm0, %v3415_v1  ;;  %v1901_v48 = vld [vmem:[%s3522_s10 + $0x8] sm:$0x8] }
  0x41   : > { %2942 = vmatprep.mubr.msk.bf16.mxu0 %vm3416_vm0, %v3415_v1  ;;  %2959 = vmatpush3.bf16.msra.mxu0 %v3329_v45  ;;  %v3835_v45 = vld [vmem:[%s3522_s10 + $0x18] sm:$0xff]   ;;  %v2618_v50 = vcombine.low %v1901_v48, %v1488_v40 }
  0x42   : > { %2815 = vmatpush3.bf16.msra.mxu1 %v3332_v51  ;;  %2960 = vmatprep.subr.bf16.mxu0 %v3415_v1  ;;  %v1924_v51 = vrot.slane %v3831_v43, 3  ;;  %v1926_v52 = vrot.slane %v3835_v45, 3 }
  0x43   : > { %2816 = vmatprep.subr.bf16.mxu1 %v3415_v1  ;;  %v1923_v57 = vrot.slane %v2618_v50, 3 }
  0x44   : > { %v3869_v59 = vsel %vm1922_vm5, %v1924_v51, %v1926_v52  ;;  %v3876_v61 = vsel %vm1922_vm5, %v1926_v52, %v1928_v56 }
  0x45   : > { %2961 = vmatpush3.bf16.msra.mxu0 %v3333_v21  ;;  %v3351_v21 = vld [vmem:[%s4215_s1 + $0xb8] sm:$0xff]   ;;  %v3881_v63 = vsel %vm1922_vm5, %v1923_v57, %v1924_v51  ;;  %v2114_v57 = vld [vmem:[%s4219_s5] sm:$0x3] }
  0x46   : > { %2817 = vmatpush3.bf16.msra.mxu1 %v3334_v62  ;;  %2982 = vmatprep.subr.bf16.mxu0 %v3415_v1  ;;  %v1930_v62 = vrot.slane %v3860_v55, 3 }
  0x47   : > { %2799 = vmatmul.mubr.bf16.gmra.mrb[16].mxu1 %v482_v3  ;;  %2838 = vmatprep.subr.bf16.mxu1 %v3415_v1  ;;  %v1350_v3 = vsel %vm1339_vm4, %v1347_v32, %v1349_v37  ;;  %v3372_v32 = vld [vmem:[%s4215_s1 + $0xf0] sm:$0xff]  }
  0x48   : > { %2943 = vmatmul.mubr.bf16.gmra.mrb[16].mxu0 %v1181_v6  ;;  %2818 = vmatprep.mubr.msk.bf16.mxu1 %vm3416_vm0, %v3415_v1  ;;  %v3886_v2 = vsel %vm1922_vm5, %v1928_v56, %v1930_v62  ;;  %v3889_v6 = vcombine.low %v1487_v54, %v1488_v40  ;;  %v1724_v40 = vshll.u32 %v3831_v43, 16  ;;  %v1730_v56 = vshrl.u32 %v3835_v45, 16 }
  0x49   : > { %2962 = vmatprep.mubr.msk.bf16.mxu0 %vm3416_vm0, %v3415_v1 }
  0x4a   : > { %v1543_v7 = vrot.slane %v3889_v6, 2  ;;  %v1716_v37 = vshll.u32 %v3889_v6, 16  ;;  %v1726_v52 = vrot.slane %v1724_v40, 3 }
  0x4c   : > { %v1545_v12 = vsel %vm1339_vm4, %v1543_v7, %v1544_v8  ;;  %v1718_v50 = vrot.slane %v1716_v37, 3  ;;  %v1732_v7 = vrot.slane %v1730_v56, 2 }
  0x4f   : > { %2819 = vmatmul.mubr.bf16.vlgmr.msra.gmra.mrb[0].mxu1 %v3540_v14  ;;  %v3341_v14 = vld [vmem:[%s4215_s1 + $0x90] sm:$0xff]  }
  0x50   : > { %2963 = vmatmul.mubr.bf16.vlgmr.msra.gmra.mrb[0].mxu0 %v1342_v20  ;;  %2839 = vmatpush3.bf16.msra.mxu1 %v3337_v13  ;;  %v3357_v13 = vld [vmem:[%s4215_s1 + $0x1c8] sm:$0xff]   ;;  %v1546_v20 = vrot.slane %v3835_v45, 2 }
  0x51   : > { %2983 = vmatpush3.bf16.msra.mxu0 %v3336_v22  ;;  %2822 = vmatprep.mubr.msk.bf16.mxu1 %vm3416_vm0, %v3415_v1 }
  0x52   : > { %2984 = vmatprep.subr.bf16.mxu0 %v3415_v1  ;;  %2840 = vmatprep.subr.bf16.mxu1 %v3415_v1  ;;  %v1547_v22 = vsel %vm1339_vm4, %v1544_v8, %v1546_v20 }
  0x53   : > { %2966 = vmatprep.mubr.msk.bf16.mxu0 %vm3416_vm0, %v3415_v1 }
  0x54   : > { %2841 = vmatpush3.bf16.msra.mxu1 %v3339_v16  ;;  %v3360_v16 = vld [vmem:[%s4215_s1 + $0x1d0] sm:$0xff]  }
  0x55   : > { %2985 = vmatpush3.bf16.msra.mxu0 %v3338_v23  ;;  %2842 = vmatprep.subr.bf16.mxu1 %v3415_v1  ;;  %v762_v23 = vrot.slane %v3613_v58, 1 }
  0x56   : > { %2986 = vmatprep.subr.bf16.mxu0 %v3415_v1 }
  0x57   : > { %2823 = vmatmul.mubr.bf16.gmra.mrb[4].mxu1 %v3543_v15  ;;  %v3344_v15 = vld [vmem:[%s4215_s1 + $0x1a0] sm:$0xff]  }
  0x58   : > { %2967 = vmatmul.mubr.bf16.gmra.mrb[4].mxu0 %v1344_v25  ;;  %2843 = vmatpush3.bf16.msra.mxu1 %v3341_v14  ;;  %v1548_v14 = vrot.slane %v3845_v31, 2  ;;  %v3363_v25 = vld [vmem:[%s4215_s1 + $0x1d8] sm:$0xff]  }
  0x59   : > { %2987 = vmatpush3.bf16.msra.mxu0 %v3340_v26  ;;  %2826 = vmatprep.mubr.msk.bf16.mxu1 %vm3416_vm0, %v3415_v1  ;;  %v3365_v26 = vld [vmem:[%s4215_s1 + $0x1e0] sm:$0xff]  }
  0x5a   : > { %2970 = vmatprep.mubr.msk.bf16.mxu0 %vm3416_vm0, %v3415_v1  ;;  %2988 = vmatprep.subr.bf16.mxu0 %v3415_v1 }
  0x5b   : > { %2844 = vmatprep.subr.bf16.mxu1 %v3415_v1 }
  0x5c   : > { %2845 = vmatpush3.bf16.msra.mxu1 %v3343_v42  ;;  %v3366_v42 = vld [vmem:[%s4215_s1 + $0xe0] sm:$0xff]  }
  0x5d   : > { %2989 = vmatpush3.bf16.msra.mxu0 %v3342_v28  ;;  %2846 = vmatprep.subr.bf16.mxu1 %v3415_v1  ;;  %v3369_v28 = vld [vmem:[%s4215_s1 + $0xe8] sm:$0xff]  }
  0x5e   : > { %2990 = vmatprep.subr.bf16.mxu0 %v3415_v1 }
  0x5f   : > { %2827 = vmatmul.mubr.bf16.gmra.mrb[8].mxu1 %v3582_v39  ;;  %v764_v39 = vrot.slane %v3642_v11, 1 }
  0x60   : > { %2971 = vmatmul.mubr.bf16.gmra.mrb[8].mxu0 %v1346_v29  ;;  %2830 = vmatprep.mubr.msk.bf16.mxu1 %vm3416_vm0, %v3415_v1  ;;  %v3370_v29 = vld [vmem:[%s4215_s1 + $0x1f0] sm:$0xff]  }
  0x61   : > { %2991 = vmatpush3.bf16.msra.mxu0 %v3344_v15  ;;  %2847 = vmatpush3.bf16.msra.mxu1 %v3345_v53  ;;  %v3371_v53 = vld [vmem:[%s3522_s10 + $0x30] ss:$0 sps:$4 sm:$0x33]  }
  0x62   : > { %2974 = vmatprep.mubr.msk.bf16.mxu0 %vm3416_vm0, %v3415_v1  ;;  %2992 = vmatprep.subr.bf16.mxu0 %v3415_v1 }
  0x63   : > { %2848 = vmatprep.subr.bf16.mxu1 %v3415_v1 }
  0x65   : > { %2993 = vmatpush3.bf16.msra.mxu0 %v3346_v33  ;;  %2849 = vmatpush3.bf16.msra.mxu1 %v3347_v34  ;;  %v766_v33 = vrot.slane %v3667_v30, 1  ;;  %v1713_v34 = vshrl.u32 %v3889_v6, 16  ;;  %v3374_v30 = vld [vmem:[%s4215_s1 + $0xf8] sm:$0xff]   ;;  %v2158_v6 = vsel %vm2156_vm7, %v2114_v57, 0  ;;  %v4131_v57 = vld [vmem:[%s4216_s2] ss:$0 sm:$0xff] }
  0x66   : > { %2994 = vmatprep.subr.bf16.mxu0 %v3415_v1  ;;  %2850 = vmatprep.subr.bf16.mxu1 %v3415_v1 }
  0x67   : > { %2831 = vmatmul.mubr.bf16.gmra.mrb[12].mxu1 %v3613_v58  ;;  %v763_v58 = vsel %vm756_vm3, %v760_v41, %v762_v23  ;;  %v1550_v41 = vrot.slane %v3860_v55, 2  ;;  %v1715_v46 = vrot.slane %v1713_v34, 2 }
  0x68   : > { %2975 = vmatmul.mubr.bf16.gmra.mrb[12].mxu0 %v1348_v44  ;;  %2834 = vmatprep.mubr.msk.bf16.mxu1 %vm3416_vm0, %v3415_v1  ;;  %v767_v44 = vsel %vm756_vm3, %v764_v39, %v766_v33 }
  0x69   : > { %2978 = vmatprep.mubr.msk.bf16.mxu0 %vm3416_vm0, %v3415_v1  ;;  %2995 = vmatpush3.bf16.msra.mxu0 %v3348_v35  ;;  %v1551_v15 = vsel %vm1339_vm4, %v1548_v14, %v1550_v41  ;;  %v1552_v35 = vrot.slane %v3371_v53, 2  ;;  %v3390_v53 = vld [vmem:[%s3840_s22 + $0x20] sm:$0xff]  }
  0x6a   : > { %2851 = vmatpush3.bf16.msra.mxu1 %v3349_v38  ;;  %2996 = vmatprep.subr.bf16.mxu0 %v3415_v1  ;;  %v1721_v38 = vshrl.u32 %v3831_v43, 16  ;;  %v1719_v43 = vor.u32 %v1718_v50, %v1715_v46 }
  0x6b   : > { %2852 = vmatprep.subr.bf16.mxu1 %v3415_v1  ;;  %v1553_v48 = vsel %vm1339_vm4, %v1550_v41, %v1552_v35 }
  0x6c   : > { %v1723_v51 = vrot.slane %v1721_v38, 2 }
  0x6d   : > { %2997 = vmatpush3.bf16.msra.mxu0 %v3350_v4  ;;  %v1733_v4 = vshll.u32 %v3835_v45, 16  ;;  %v3376_v45 = vld [vmem:[%s4215_s1 + $0x208] sm:$0xff]  }
  0x6e   : > { %2853 = vmatpush3.bf16.msra.mxu1 %v3351_v21  ;;  %3018 = vmatprep.subr.bf16.mxu0 %v3415_v1  ;;  %v1727_v54 = vor.u32 %v1726_v52, %v1723_v51 }
  0x6f   : > { %2835 = vmatmul.mubr.bf16.gmra.mrb[16].mxu1 %v3642_v11  ;;  %2874 = vmatprep.subr.bf16.mxu1 %v3415_v1  ;;  %v765_v11 = vsel %vm756_vm3, %v762_v23, %v764_v39  ;;  %v1735_v8 = vrot.slane %v1733_v4, 3  ;;  %v3379_v23 = vld [vmem:[%s4215_s1 + $0x220] sm:$0xff]  }
  0x70   : > { %2979 = vmatmul.mubr.bf16.gmra.mrb[16].mxu0 %v1350_v3  ;;  %2854 = vmatprep.mubr.msk.bf16.mxu1 %vm3416_vm0, %v3415_v1  ;;  %v1728_v21 = vsel %vm1711_vm6, %v1719_v43, %v1727_v54  ;;  %v3375_v3 = vld [vmem:[%s4215_s1 + $0x200] sm:$0xff]  }
  0x71   : > { %2998 = vmatprep.mubr.msk.bf16.mxu0 %vm3416_vm0, %v3415_v1 }
  0x77   : > { %2855 = vmatmul.mubr.bf16.vlgmr.msra.gmra.mrb[0].mxu1 %v3751_v19  ;;  %v3361_v19 = vld [vmem:[%s4215_s1 + $0xd0] sm:$0xff]  }
  0x78   : > { %2999 = vmatmul.mubr.bf16.vlgmr.msra.gmra.mrb[0].mxu0 %v1545_v12  ;;  %2875 = vmatpush3.bf16.msra.mxu1 %v3356_v10  ;;  %v1736_v10 = vor.u32 %v1735_v8, %v1732_v7  ;;  %v1739_v12 = vshrl.u32 %v3845_v31, 16 }
  0x79   : > { %3019 = vmatpush3.bf16.msra.mxu0 %v3355_v18  ;;  %2858 = vmatprep.mubr.msk.bf16.mxu1 %vm3416_vm0, %v3415_v1  ;;  %v1742_v18 = vshll.u32 %v3845_v31, 16 }
  0x7a   : > { %3020 = vmatprep.subr.bf16.mxu0 %v3415_v1  ;;  %2876 = vmatprep.subr.bf16.mxu1 %v3415_v1 }
  0x7b   : > { %3002 = vmatprep.mubr.msk.bf16.mxu0 %vm3416_vm0, %v3415_v1 }
  0x7c   : > { %2877 = vmatpush3.bf16.msra.mxu1 %v3358_v17  ;;  %v3377_v17 = vld [vmem:[%s4215_s1 + $0x210] sm:$0xff]  }
  0x7d   : > { %3021 = vmatpush3.bf16.msra.mxu0 %v3357_v13  ;;  %2878 = vmatprep.subr.bf16.mxu1 %v3415_v1  ;;  %v1741_v13 = vrot.slane %v1739_v12, 2 }
  0x7e   : > { %3022 = vmatprep.subr.bf16.mxu0 %v3415_v1 }
  0x7f   : > { %2859 = vmatmul.mubr.bf16.gmra.mrb[4].mxu1 %v3698_v47  ;;  %v1549_v47 = vsel %vm1339_vm4, %v1546_v20, %v1548_v14  ;;  %v1744_v20 = vrot.slane %v1742_v18, 3 }
  0x80   : > { %3003 = vmatmul.mubr.bf16.gmra.mrb[4].mxu0 %v1547_v22  ;;  %2879 = vmatpush3.bf16.msra.mxu1 %v3361_v19  ;;  %v3378_v19 = vld [vmem:[%s4215_s1 + $0x218] sm:$0xff]   ;;  %v1748_v22 = vshrl.u32 %v3860_v55, 16 }
  0x81   : > { %3023 = vmatpush3.bf16.msra.mxu0 %v3360_v16  ;;  %2862 = vmatprep.mubr.msk.bf16.mxu1 %vm3416_vm0, %v3415_v1  ;;  %v1745_v31 = vor.u32 %v1744_v20, %v1741_v13  ;;  %v1751_v16 = vshll.u32 %v3860_v55, 16 }
  0x82   : > { %3006 = vmatprep.mubr.msk.bf16.mxu0 %vm3416_vm0, %v3415_v1  ;;  %3024 = vmatprep.subr.bf16.mxu0 %v3415_v1 }
  0x83   : > { %2880 = vmatprep.subr.bf16.mxu1 %v3415_v1  ;;  %v1753_v14 = vrot.slane %v1751_v16, 3 }
  0x84   : > { %2881 = vmatpush3.bf16.msra.mxu1 %v3364_v24  ;;  %v1750_v24 = vrot.slane %v1748_v22, 2 }
  0x85   : > { %3025 = vmatpush3.bf16.msra.mxu0 %v3363_v25  ;;  %2882 = vmatprep.subr.bf16.mxu1 %v3415_v1  ;;  %v3383_v25 = vld [vmem:[%s3522_s10 + $0x30] ss:$0 sps:$4 sm:$0x77]  }
  0x86   : > { %3026 = vmatprep.subr.bf16.mxu0 %v3415_v1 }
  0x87   : > { %2863 = vmatmul.mubr.bf16.gmra.mrb[8].mxu1 %v763_v58  ;;  %v1754_v58 = vor.u32 %v1753_v14, %v1750_v24 }
  0x88   : > { %3007 = vmatmul.mubr.bf16.gmra.mrb[8].mxu0 %v1549_v47  ;;  %2866 = vmatprep.mubr.msk.bf16.mxu1 %vm3416_vm0, %v3415_v1  ;;  %v3380_v47 = vld [vmem:[%s4215_s1 + $0x228] sm:$0xff]  }
  0x89   : > { %3027 = vmatpush3.bf16.msra.mxu0 %v3365_v26  ;;  %2883 = vmatpush3.bf16.msra.mxu1 %v3366_v42  ;;  %v1757_v26 = vshrl.u32 %v3383_v25, 16  ;;  %v1760_v42 = vshll.u32 %v3383_v25, 16  ;;  %v1755_v39 = vsel %vm1711_vm6, %v1745_v31, %v1754_v58 }
  0x8a   : > { %3010 = vmatprep.mubr.msk.bf16.mxu0 %vm3416_vm0, %v3415_v1  ;;  %3028 = vmatprep.subr.bf16.mxu0 %v3415_v1 }
  0x8b   : > { %2884 = vmatprep.subr.bf16.mxu1 %v3415_v1  ;;  %v1759_v41 = vrot.slane %v1757_v26, 2 }
  0x8d   : > { %3029 = vmatpush3.bf16.msra.mxu0 %v3368_v27  ;;  %2885 = vmatpush3.bf16.msra.mxu1 %v3369_v28  ;;  %v1762_v27 = vrot.slane %v1760_v42, 3 }
  0x8e   : > { %3030 = vmatprep.subr.bf16.mxu0 %v3415_v1  ;;  %2886 = vmatprep.subr.bf16.mxu1 %v3415_v1 }
  0x8f   : > { %2867 = vmatmul.mubr.bf16.gmra.mrb[12].mxu1 %v765_v11  ;;  %v1763_v28 = vor.u32 %v1762_v27, %v1759_v41  ;;  %v3384_v11 = vld [vmem:[%s4215_s1 + $0x238] sm:$0xff]  }
  0x90   : > { %3011 = vmatmul.mubr.bf16.gmra.mrb[12].mxu0 %v1551_v15  ;;  %2870 = vmatprep.mubr.msk.bf16.mxu1 %vm3416_vm0, %v3415_v1 }
  0x91   : > { %3014 = vmatprep.mubr.msk.bf16.mxu0 %vm3416_vm0, %v3415_v1  ;;  %3031 = vmatpush3.bf16.msra.mxu0 %v3370_v29  ;;  %v1764_v15 = vsel %vm1711_vm6, %v1754_v58, %v1763_v28  ;;  %v3388_v29 = vld [vmem:[%s3840_s22 + $0x10] sm:$0xff]  }
  0x92   : > { %2887 = vmatpush3.bf16.msra.mxu1 %v3372_v32  ;;  %3032 = vmatprep.subr.bf16.mxu0 %v3415_v1 }
  0x93   : > { %2888 = vmatprep.subr.bf16.mxu1 %v3415_v1 }
  0x95   : > { %3033 = vmatpush3.bf16.msra.mxu0 %v3373_v36 }
  0x96   : > { %2889 = vmatpush3.bf16.msra.mxu1 %v3374_v30  ;;  %3054 = vmatprep.subr.bf16.mxu0 %v3415_v1 }
  0x97   : > { %2871 = vmatmul.mubr.bf16.gmra.mrb[16].mxu1 %v767_v44  ;;  %3090 = vmatprep.subr.bf16.mxu1 %v3415_v1 }
  0x98   : > { %3015 = vmatmul.mubr.bf16.gmra.mrb[16].mxu0 %v1553_v48  ;;  %2890 = vmatprep.mubr.msk.bf16.mxu1 %vm3416_vm0, %v3415_v1 }
  0x99   : > { %3034 = vmatprep.mubr.msk.bf16.mxu0 %vm3416_vm0, %v3415_v1 }
  0x9f   : > { %2891 = vmatmul.mubr.bf16.vlgmr.msra.gmra.mrb[0].mxu1 %v3717_v60  ;;  %v1737_v60 = vsel %vm1711_vm6, %v1727_v54, %v1736_v10  ;;  %v4126_v54 = vld [vmem:[%s4220_s6] ss:$0 sm:$0xff] }
  0xa0   : > { %3035 = vmatmul.mubr.bf16.vlgmr.msra.gmra.mrb[0].mxu0 %v1728_v21  ;;  %3091 = vmatpush3.bf16.msra.mxu1 %v2158_v6 }
  0xa1   : > { %3055 = vmatpush3.bf16.msra.mxu0 %v3375_v3  ;;  %2894 = vmatprep.mubr.msk.bf16.mxu1 %vm3416_vm0, %v3415_v1  ;;  %v4137_v3 = vld [vmem:[%s4221_s7] ss:$0 sm:$0xff] }
  0xa2   : > { %3056 = vmatprep.subr.bf16.mxu0 %v3415_v1  ;;  %3038 = vmatprep.mubr.msk.bf16.mxu0 %vm3416_vm0, %v3415_v1 }
  0xa5   : > { %3057 = vmatpush3.bf16.msra.mxu0 %v3376_v45 }
  0xa6   : > { %3058 = vmatprep.subr.bf16.mxu0 %v3415_v1 }
  0xa7   : > { %2895 = vmatmul.mubr.bf16.gmra.mrb[4].mxu1 %v3727_v0  ;;  %v1746_v0 = vsel %vm1711_vm6, %v1736_v10, %v1745_v31  ;;  %v4142_v10 = vld [vmem:[%s4217_s3] ss:$0 sm:$0xff] }
  0xa8   : > { %3039 = vmatmul.mubr.bf16.gmra.mrb[4].mxu0 %v1737_v60  ;;  %2898 = vmatprep.mubr.msk.bf16.mxu1 %vm3416_vm0, %v3415_v1 }
  0xa9   : > { %3059 = vmatpush3.bf16.msra.mxu0 %v3377_v17  ;;  %3042 = vmatprep.mubr.msk.bf16.mxu0 %vm3416_vm0, %v3415_v1 }
  0xaa   : > { %3060 = vmatprep.subr.bf16.mxu0 %v3415_v1 }
  0xad   : > { %3061 = vmatpush3.bf16.msra.mxu0 %v3378_v19 }
  0xae   : > { %3062 = vmatprep.subr.bf16.mxu0 %v3415_v1 }
  0xaf   : > { %2899 = vmatmul.mubr.bf16.gmra.mrb[8].mxu1 %v3732_v5  ;;  %v3381_v5 = vld [vmem:[%s4215_s1 + $0x230] sm:$0xff]  }
  0xb0   : > { %3043 = vmatmul.mubr.bf16.gmra.mrb[8].mxu0 %v1746_v0  ;;  %2902 = vmatprep.mubr.msk.bf16.mxu1 %vm3416_vm0, %v3415_v1 }
  0xb1   : > { %3063 = vmatpush3.bf16.msra.mxu0 %v3379_v23  ;;  %3046 = vmatprep.mubr.msk.bf16.mxu0 %vm3416_vm0, %v3415_v1 }
  0xb2   : > { %3064 = vmatprep.subr.bf16.mxu0 %v3415_v1 }
  0xb5   : > { %3065 = vmatpush3.bf16.msra.mxu0 %v3380_v47 }
  0xb6   : > { %3066 = vmatprep.subr.bf16.mxu0 %v3415_v1 }
  0xb7   : > { %2903 = vmatmul.mubr.bf16.gmra.mrb[12].mxu1 %v3740_v9  ;;  %v3386_v9 = vld [vmem:[%s3840_s22] sm:$0xff]  }
  0xb8   : > { %3047 = vmatmul.mubr.bf16.gmra.mrb[12].mxu0 %v1755_v39  ;;  %2906 = vmatprep.mubr.msk.bf16.mxu1 %vm3416_vm0, %v3415_v1 }
  0xb9   : > { %3050 = vmatprep.mubr.msk.bf16.mxu0 %vm3416_vm0, %v3415_v1  ;;  %3067 = vmatpush3.bf16.msra.mxu0 %v3381_v5 }
  0xba   : > { %3068 = vmatprep.subr.bf16.mxu0 %v3415_v1 }
  0xbd   : > { %3069 = vmatpush3.bf16.msra.mxu0 %v3384_v11 }
  0xbf   : > { %2907 = vmatmul.mubr.bf16.gmra.mrb[16].mxu1 %v3852_v49  ;;  %v3387_v49 = vld [vmem:[%s3840_s22 + $0x8] sm:$0xff]  }
  0xc0   : > { %3051 = vmatmul.mubr.bf16.gmra.mrb[16].mxu0 %v1764_v15  ;;  %3092 = vmatprep.mubr.msk.bf16.mxu1 %vm3416_vm0, %v3415_v1 }
  0xc1   : > { %3070 = vmatprep.mubr.msk.bf16.mxu0 %vm3416_vm0, %v3415_v1 }
  0xc7   : > { %3093 = vmatmul.mubr.msk.bf16.vlgmr.msra.gmra.mrb[20].mxu1 %vm2140_vm8, %v3386_v9 }
  0xc8   : > { %3071 = vmatmul.mubr.bf16.vlgmr.msra.gmra.mrb[0].mxu0 %v3881_v63  ;;  %3096 = vmatprep.mubr.msk.bf16.mxu1 %vm3416_vm0, %v3415_v1  ;;  %v3389_v63 = vld [vmem:[%s3840_s22 + $0x18] sm:$0xff]  }
  0xc9   : > { %3074 = vmatprep.mubr.msk.bf16.mxu0 %vm3416_vm0, %v3415_v1 }
  0xcf   : > { %3097 = vmatmul.mubr.msk.bf16.gmra.mrb[24].mxu1 %vm2140_vm8, %v3387_v49 }
  0xd0   : > { %3075 = vmatmul.mubr.bf16.gmra.mrb[4].mxu0 %v3869_v59  ;;  %3100 = vmatprep.mubr.msk.bf16.mxu1 %vm3416_vm0, %v3415_v1  ;;  %v1932_v59 = vrot.slane %v3383_v25, 3 }
  0xd1   : > { %3078 = vmatprep.mubr.msk.bf16.mxu0 %vm3416_vm0, %v3415_v1 }
  0xd7   : > { %3101 = vmatmul.mubr.msk.bf16.gmra.mrb[28].mxu1 %vm2140_vm8, %v3388_v29 }
  0xd8   : > { %3079 = vmatmul.mubr.bf16.gmra.mrb[8].mxu0 %v3876_v61  ;;  %3104 = vmatprep.mubr.msk.bf16.mxu1 %vm3416_vm0, %v3415_v1  ;;  %v1933_v61 = vsel %vm1922_vm5, %v1930_v62, %v1932_v59 }
  0xd9   : > { %3082 = vmatprep.mubr.msk.bf16.mxu0 %vm3416_vm0, %v3415_v1 }
  0xdf   : > { %3105 = vmatmul.mubr.msk.bf16.gmra.mrb[32].mxu1 %vm2140_vm8, %v3389_v63 }
  0xe0   : > { %3083 = vmatmul.mubr.bf16.gmra.mrb[12].mxu0 %v3886_v2  ;;  %3108 = vmatprep.mubr.msk.bf16.mxu1 %vm3416_vm0, %v3415_v1 }
  0xe1   : > { %3086 = vmatprep.mubr.msk.bf16.mxu0 %vm3416_vm0, %v3415_v1 }
  0xe7   : > { %3109 = vmatmul.mubr.msk.bf16.gmra.mrb[36].mxu1 %vm2140_vm8, %v3390_v53 }
  0xe8   : > { %3087 = vmatmul.mubr.bf16.gmra.mrb[16].mxu0 %v1933_v61 }
 0x172   : > { %v1058_v32 = vpop.f32.mrb[0].mxu1 }
 0x173   : > { %v2892_v33 = vpop.f32.mrb[1].mxu1 }
 0x174   : > { %v1061_v34 = vpop.f32.mrb[2].mxu1 }
 0x175   : > { %v2893_v35 = vpop.f32.mrb[3].mxu1 }
 0x17a   : > { %v1066_v2 = vpop.f32.mrb[4].mxu1 }
 0x17b   : > { %v2896_v36 = vpop.f32.mrb[5].mxu1 }
 0x17c   : > { %v1069_v37 = vpop.f32.mrb[6].mxu1 }
 0x17d   : > { %v2897_v38 = vpop.f32.mrb[7].mxu1 }
 0x182   : > { %v4111_v40 = vpop.f32.mrb[8].mxu1 }
 0x183   : > { %v2900_v1 = vpop.f32.mrb[9].mxu1 }
 0x184   : > { %v4113_v30 = vpop.f32.mrb[10].mxu1 }
 0x185   : > { %v2901_v44 = vpop.f32.mrb[11].mxu1 }
 0x18a   : > { %v4115_v55 = vpop.f32.mrb[12].mxu1 }
 0x18b   : > { %v2904_v62 = vpop.f32.mrb[13].mxu1 }
 0x18c   : > { %v4117_v46 = vpop.f32.mrb[14].mxu1 }
 0x18d   : > { %v2905_v48 = vpop.f32.mrb[15].mxu1 }
 0x192   : > { %v4119_v50 = vpop.f32.mrb[16].mxu1 }
 0x193   : > { %v2908_v51 = vpop.f32.mrb[17].mxu1 }
 0x194   : > { %v4121_v52 = vpop.f32.mrb[18].mxu1 }
 0x195   : > { %v2909_v43 = vpop.f32.mrb[19].mxu1 }
 0x19a   : > { %v2194_v56 = vpop.f32.mrb[20].mxu1 }
 0x19b   : > { %v2021_v4 = vpop.f32.mrb[0].mxu0  ;;  %v2240_v21 = vmul.f32 %v4126_v54, %v2194_v56  ;;  %v3094_v6 = vpop.f32.mrb[21].mxu1 }
 0x19c   : > { %v3112_v7 = vadd.f32 %v2021_v4, %v1058_v32  ;;  %v3072_v8 = vpop.f32.mrb[1].mxu0  ;;  %v2197_v45 = vpop.f32.mrb[22].mxu1 }
 0x19d   : > { %v2024_v12 = vpop.f32.mrb[2].mxu0  ;;  %v3095_v18 = vpop.f32.mrb[23].mxu1  ;;  %v2257_v17 = vadd.f32 %v4137_v3, %v2240_v21  ;;  %v2241_v20 = vmul.f32 %v4126_v54, %v2197_v45 }
 0x19e   : > { %v2077_v60 = vmul.f32 %v3112_v7, %v4131_v57  ;;  %v3113_v13 = vadd.f32 %v2024_v12, %v1061_v34  ;;  %v3073_v31 = vpop.f32.mrb[3].mxu0 }
 0x19f   : > { %v2258_v23 = vadd.f32 %v4137_v3, %v2241_v20 }
 0x1a0   : > { %v2094_v19 = vadd.f32 %v4142_v10, %v2077_v60  ;;  %v2078_v22 = vmul.f32 %v3113_v13, %v4131_v57 }
 0x1a2   : > { %v2267_v16 = vadd.f32 %v2257_v17, %v2094_v19  ;;  %v2095_v0 = vadd.f32 %v4142_v10, %v2078_v22  ;;  %v2202_v24 = vpop.f32.mrb[24].mxu1 }
 0x1a3   : > { %v2029_v14 = vpop.f32.mrb[4].mxu0  ;;  %v2242_v25 = vmul.f32 %v4126_v54, %v2202_v24  ;;  %v3098_v58 = vpop.f32.mrb[25].mxu1 }
 0x1a4   : > { %v2277_v47 = vmax.f32 %v2267_v16, 0.0  ;;  %v2268_v26 = vadd.f32 %v2258_v23, %v2095_v0  ;;  %v3114_v42 = vadd.f32 %v2029_v14, %v1066_v2  ;;  %v3076_v39 = vpop.f32.mrb[5].mxu0  ;;  %v2205_v5 = vpop.f32.mrb[26].mxu1 }
 0x1a5   : > { %v2259_v41 = vadd.f32 %v4137_v3, %v2242_v25  ;;  %v2032_v27 = vpop.f32.mrb[6].mxu0  ;;  %v3099_v28 = vpop.f32.mrb[27].mxu1  ;;  %v2243_v49 = vmul.f32 %v4126_v54, %v2205_v5 }
 0x1a6   : > { %2287 = vst [vmem:[%s4155_s21] sm:$0xff] %v2277_v47  ;;  %v2278_v11 = vmax.f32 %v2268_v26, 0.0  ;;  %v2079_v15 = vmul.f32 %v3114_v42, %v4131_v57  ;;  %v3115_v9 = vadd.f32 %v2032_v27, %v1069_v37  ;;  %v3077_v29 = vpop.f32.mrb[7].mxu0 }
 0x1a7   : > { %v2260_v32 = vadd.f32 %v4137_v3, %v2243_v49 }
 0x1a8   : > { %2288 = vst [vmem:[%s4155_s21 + $0x8] sm:$0xff] %v2278_v11  ;;  %v2096_v63 = vadd.f32 %v4142_v10, %v2079_v15  ;;  %v2080_v59 = vmul.f32 %v3115_v9, %v4131_v57 }
 0x1aa   : > { %v2269_v53 = vadd.f32 %v2259_v41, %v2096_v63  ;;  %v2097_v61 = vadd.f32 %v4142_v10, %v2080_v59  ;;  %v2210_v33 = vpop.f32.mrb[28].mxu1 }
 0x1ab   : > { %v2037_v34 = vpop.f32.mrb[8].mxu0  ;;  %v2244_v35 = vmul.f32 %v4126_v54, %v2210_v33  ;;  %v3102_v2 = vpop.f32.mrb[29].mxu1 }
 0x1ac   : > { %v2279_v36 = vmax.f32 %v2269_v53, 0.0  ;;  %v2270_v37 = vadd.f32 %v2260_v32, %v2097_v61  ;;  %v3116_v38 = vadd.f32 %v2037_v34, %v4111_v40  ;;  %v3080_v1 = vpop.f32.mrb[9].mxu0  ;;  %v2213_v44 = vpop.f32.mrb[30].mxu1 }
 0x1ad   : > { %v2261_v62 = vadd.f32 %v4137_v3, %v2244_v35  ;;  %v2040_v48 = vpop.f32.mrb[10].mxu0  ;;  %v3103_v51 = vpop.f32.mrb[31].mxu1  ;;  %v2245_v21 = vmul.f32 %v4126_v54, %v2213_v44 }
 0x1ae   : > { %2289 = vst [vmem:[%s4155_s21 + $0x10] sm:$0xff] %v2279_v36  ;;  %v2280_v43 = vmax.f32 %v2270_v37, 0.0  ;;  %v2081_v56 = vmul.f32 %v3116_v38, %v4131_v57  ;;  %v3117_v4 = vadd.f32 %v2040_v48, %v4113_v30  ;;  %v3081_v6 = vpop.f32.mrb[11].mxu0 }
 0x1af   : > { %v2262_v12 = vadd.f32 %v4137_v3, %v2245_v21 }
 0x1b0   : > { %2290 = vst [vmem:[%s4155_s21 + $0x18] sm:$0xff] %v2280_v43  ;;  %v2098_v7 = vadd.f32 %v4142_v10, %v2081_v56  ;;  %v2082_v40 = vmul.f32 %v3117_v4, %v4131_v57 }
 0x1b2   : > { %v2271_v8 = vadd.f32 %v2261_v62, %v2098_v7  ;;  %v2099_v45 = vadd.f32 %v4142_v10, %v2082_v40  ;;  %v2218_v18 = vpop.f32.mrb[32].mxu1 }
 0x1b3   : > { %v2045_v60 = vpop.f32.mrb[12].mxu0  ;;  %v2246_v17 = vmul.f32 %v4126_v54, %v2218_v18  ;;  %v3106_v30 = vpop.f32.mrb[33].mxu1 }
 0x1b4   : > { %v2281_v13 = vmax.f32 %v2271_v8, 0.0  ;;  %v2272_v20 = vadd.f32 %v2262_v12, %v2099_v45  ;;  %v3118_v31 = vadd.f32 %v2045_v60, %v4115_v55  ;;  %v3084_v19 = vpop.f32.mrb[13].mxu0  ;;  %v2221_v22 = vpop.f32.mrb[34].mxu1 }
 0x1b5   : > { %v2263_v16 = vadd.f32 %v4137_v3, %v2246_v17  ;;  %v2048_v0 = vpop.f32.mrb[14].mxu0  ;;  %v3107_v23 = vpop.f32.mrb[35].mxu1  ;;  %v2247_v58 = vmul.f32 %v4126_v54, %v2221_v22 }
 0x1b6   : > { %2291 = vst [vmem:[%s4155_s21 + $0x20] sm:$0xff] %v2281_v13  ;;  %v2282_v24 = vmax.f32 %v2272_v20, 0.0  ;;  %v2083_v14 = vmul.f32 %v3118_v31, %v4131_v57  ;;  %v3119_v25 = vadd.f32 %v2048_v0, %v4117_v46  ;;  %v3085_v47 = vpop.f32.mrb[15].mxu0 }
 0x1b7   : > { %v2264_v5 = vadd.f32 %v4137_v3, %v2247_v58 }
 0x1b8   : > { %2292 = vst [vmem:[%s4155_s21 + $0x28] sm:$0xff] %v2282_v24  ;;  %v2100_v26 = vadd.f32 %v4142_v10, %v2083_v14  ;;  %v2084_v55 = vmul.f32 %v3119_v25, %v4131_v57 }
 0x1ba   : > { %v2273_v42 = vadd.f32 %v2263_v16, %v2100_v26  ;;  %v2101_v39 = vadd.f32 %v4142_v10, %v2084_v55  ;;  %v2226_v41 = vpop.f32.mrb[36].mxu1 }
 0x1bb   : > { %v2053_v27 = vpop.f32.mrb[16].mxu0  ;;  %v2248_v28 = vmul.f32 %v4126_v54, %v2226_v41  ;;  %v3110_v46 = vpop.f32.mrb[37].mxu1 }
 0x1bc   : > { %v2283_v11 = vmax.f32 %v2273_v42, 0.0  ;;  %v2274_v15 = vadd.f32 %v2264_v5, %v2101_v39  ;;  %v3120_v9 = vadd.f32 %v2053_v27, %v4119_v50  ;;  %v3088_v49 = vpop.f32.mrb[17].mxu0  ;;  %v2229_v29 = vpop.f32.mrb[38].mxu1 }
 0x1bd   : > { %v2265_v63 = vadd.f32 %v4137_v3, %v2248_v28  ;;  %v2056_v59 = vpop.f32.mrb[18].mxu0  ;;  %v3111_v53 = vpop.f32.mrb[39].mxu1  ;;  %v2249_v34 = vmul.f32 %v4126_v54, %v2229_v29 }
 0x1be   : > { %2293 = vst [vmem:[%s4155_s21 + $0x30] sm:$0xff] %v2283_v11  ;;  %v2284_v61 = vmax.f32 %v2274_v15, 0.0  ;;  %v2085_v32 = vmul.f32 %v3120_v9, %v4131_v57  ;;  %v3121_v33 = vadd.f32 %v2056_v59, %v4121_v52  ;;  %v3089_v35 = vpop.f32.mrb[19].mxu0 }
 0x1bf   : > { %v2266_v38 = vadd.f32 %v4137_v3, %v2249_v34 }
 0x1c0   : > { %2294 = vst [vmem:[%s4155_s21 + $0x38] sm:$0xff] %v2284_v61  ;;  %v2102_v50 = vadd.f32 %v4142_v10, %v2085_v32  ;;  %v2086_v2 = vmul.f32 %v3121_v33, %v4131_v57 }
 0x1c2   : > { %v2275_v36 = vadd.f32 %v2265_v63, %v2102_v50  ;;  %v2103_v37 = vadd.f32 %v4142_v10, %v2086_v2 }
 0x1c4   : > { %v2285_v1 = vmax.f32 %v2275_v36, 0.0  ;;  %v2276_v44 = vadd.f32 %v2266_v38, %v2103_v37 }
 0x1c6   : > { %2295 = vst [vmem:[%s4155_s21 + $0x40] sm:$0xff] %v2285_v1  ;;  %v2286_v62 = vmax.f32 %v2276_v44, 0.0 }
 0x1c8   : > { %2296 = vst [vmem:[%s4155_s21 + $0x48] sm:$0xff] %v2286_v62 }
 0x1c9 PF: > { %s18_s29 = sadd.s32 1, %s3413_s29   ;;  %s4223_s27 = smov %s3409_s28 }
 0x1ca   : > { %p15_p5 = scmp.ge.s32.totalorder %s18_s29, 4   ;;  %s4224_s28 = smov %s4226_s30 }
 0x1cc   :  { %17 = sbr.rel (!%p15_p5) target bundleno = 2 (0x2), region = 93 }

</bundles_post_ra>
